<compile_context>
chip_gen: v6e
topology: v6e:2x2x1
jax: 0.10.0
libtpu: 0.0.40
codegen_flags: <defaults>
</compile_context>

<pallas_src>
import functools
import math

import jax
import jax.numpy as jnp
from jax import lax
from jax.experimental import pallas as pl
from jax.experimental.pallas import tpu as pltpu


# ---------------------------------------------------------------------------
# Kernel
# ---------------------------------------------------------------------------
def ctx_attn_kernel(seqlen_ref,                       # [TB, 1, 1] int32 (VMEM)
                    evo_ref, plm_ref,                 # activations
                    w_all_ref, b_all_ref,             # folded 5-tap Q/K conv
                    wv_ref, bv_ref,                   # v Linear
                    out_ref,
                    *, qk_dim, matmul_dtype):
    TB, L, Dq = evo_ref.shape
    N = TB * L
    vd = wv_ref.shape[1]

    evo = evo_ref[...].reshape(N, Dq).astype(matmul_dtype)      # [TB*L, Dq]
    plm = plm_ref[...].reshape(N, plm_ref.shape[2]).astype(matmul_dtype)

    # ---- fused Q/K projection: single folded 5-tap "same" conv -------------
    # centre tap (o = 0): no shift, no mask.
    acc = jnp.dot(evo, w_all_ref[2].astype(matmul_dtype),
                  preferred_element_type=jnp.float32)           # [N, 2*qk]
    # position-in-sequence of every row of the flattened block
    t_idx = lax.broadcasted_iota(jnp.int32, (TB, L, Dq), 1).reshape(N, Dq)
    for o in (-2, -1, 1, 2):
        # rolled[r] = evo[(r + o) mod N]; rows whose source falls outside the
        # current sequence row are zero-masked (this also removes wrap-around
        # across batch rows / the array ends).
        rolled = pltpu.roll(evo, shift=(-o) % N, axis=0)
        valid = (t_idx >= -o) if o < 0 else (t_idx < L - o)
        acc = acc + jnp.dot(jnp.where(valid, rolled, 0.0),
                            w_all_ref[o + 2].astype(matmul_dtype),
                            preferred_element_type=jnp.float32)
    qk_all = acc + b_all_ref[...]                               # [N, 2*qk] f32
    # Q columns already carry the 1/sqrt(qk) scale (folded on the host).
    Q = qk_all[:, :qk_dim].reshape(TB, L, qk_dim)
    K = qk_all[:, qk_dim:].reshape(TB, L, qk_dim)

    # ---- V projection -------------------------------------------------------
    V = (jnp.dot(plm, wv_ref[...].astype(matmul_dtype),
                 preferred_element_type=jnp.float32)
         + bv_ref[...]).reshape(TB, L, vd)

    # ---- masked softmax attention (f32 throughout) --------------------------
    scores = jnp.einsum("bqd,bkd->bqk",
                        Q.astype(matmul_dtype), K.astype(matmul_dtype),
                        preferred_element_type=jnp.float32)     # [TB, L, L]
    col = lax.broadcasted_iota(jnp.int32, (TB, L, L), 2)
    scores = jnp.where(col < seqlen_ref[...], scores, -1e6)
    scores = scores - jnp.max(scores, axis=-1, keepdims=True)
    p = jnp.exp(scores)
    atten = p * pl.reciprocal(jnp.sum(p, axis=-1, keepdims=True), approx=True)

    # ---- output: atten @ V + V ----------------------------------------------
    ctx = jnp.einsum("bqk,bkd->bqd",
                     atten.astype(matmul_dtype), V.astype(matmul_dtype),
                     preferred_element_type=jnp.float32)
    out_ref[...] = (ctx + V).astype(out_ref.dtype)


# ---------------------------------------------------------------------------
# Host-side weight folding:  cn3/cn5 + k-Linear + q-Linear -> one 5-tap conv
# (the 1/sqrt(qk) attention scale is folded into the Q columns)
# ---------------------------------------------------------------------------
def fold_params(params, q_input_dim, qk_dim):
    wq, bq = params["wq"], params["bq"]
    w3, b3 = params["w3"], params["b3"]
    w5, b5 = params["w5"], params["b5"]
    wk, bk = params["wk"], params["bk"]
    wk0 = wk[:q_input_dim]                               # evo passthrough rows
    wk1 = wk[q_input_dim:q_input_dim + qk_dim]           # k3 rows
    wk2 = wk[q_input_dim + qk_dim:]                      # k5 rows
    w3p = jnp.pad(w3, ((1, 1), (0, 0), (0, 0)))          # 3-tap -> 5-tap
    wk_eff = (jnp.einsum("tio,od->tid", w3p, wk1)
              + jnp.einsum("tio,od->tid", w5, wk2))      # [5, Dq, qk]
    wk_eff = wk_eff.at[2].add(wk0)                       # centre tap: + Wk0
    bk_eff = b3 @ wk1 + b5 @ wk2 + bk                    # [1, qk]
    norm_fact = 1.0 / math.sqrt(qk_dim)
    wq_tap = (jnp.zeros_like(wk_eff).at[2].set(wq)       # Q only on centre tap
              * norm_fact)                               # fold score scale
    bq_eff = bq * norm_fact
    w_all = jnp.concatenate([wq_tap, wk_eff], axis=2)    # [5, Dq, 2*qk]
    b_all = jnp.concatenate([bq_eff, bk_eff], axis=1)    # [1, 2*qk]
    return w_all, b_all


# ---------------------------------------------------------------------------
# Wrapper
# ---------------------------------------------------------------------------
def contextual_attention(plm_embedding, evo_local, seqlengths, params,
                         *, batch_block=1, matmul_dtype=jnp.float32):
    B, L, Dq = evo_local.shape
    Dvin = plm_embedding.shape[2]
    qk = params["wq"].shape[1]
    vd = params["wv"].shape[1]
    assert B % batch_block == 0

    w_all, b_all = fold_params(params, Dq, qk)
    seqlen3d = seqlengths.astype(jnp.int32).reshape(B, 1, 1)

    kernel = functools.partial(ctx_attn_kernel, qk_dim=qk,
                               matmul_dtype=matmul_dtype)

    # Constant (weight/bias) blocks: index_map never changes.
    def const_spec(shape):
        nd = len(shape)
        return pl.BlockSpec(shape, lambda g, _n=nd: (0,) * _n)

    grid_spec = pltpu.PrefetchScalarGridSpec(
        num_scalar_prefetch=0,
        grid=(B // batch_block,),
        in_specs=[
            pl.BlockSpec((batch_block, 1, 1), lambda g: (g, 0, 0)),
            pl.BlockSpec((batch_block, L, Dq), lambda g: (g, 0, 0)),
            pl.BlockSpec((batch_block, L, Dvin), lambda g: (g, 0, 0)),
            const_spec(w_all.shape), const_spec(b_all.shape),
            const_spec(params["wv"].shape), const_spec(params["bv"].shape),
        ],
        out_specs=pl.BlockSpec((batch_block, L, vd), lambda g: (g, 0, 0)),
    )

    return pl.pallas_call(
        kernel,
        out_shape=jax.ShapeDtypeStruct((B, L, vd), jnp.float32),
        grid_spec=grid_spec,
        compiler_params=pltpu.CompilerParams(
            dimension_semantics=("parallel",)),
    )(seqlen3d, evo_local, plm_embedding, w_all, b_all,
      params["wv"], params["bv"])


# ---------------------------------------------------------------------------
# Pure-JAX reference (unfolded, mirrors the PyTorch module) for correctness
# ---------------------------------------------------------------------------
def reference(plm, evo, seqlens, params):
    def conv_same(x, w, b):
        k = w.shape[0]
        half = k // 2
        L = x.shape[1]
        xp = jnp.pad(x, ((0, 0), (half, half), (0, 0)))
        out = jnp.zeros(x.shape[:2] + (w.shape[2],), jnp.float32)
        for i in range(k):
            out = out + jnp.einsum("bli,io->blo", xp[:, i:i + L, :], w[i])
        return out + b

    Q = evo @ params["wq"] + params["bq"]
    k3 = conv_same(evo, params["w3"], params["b3"])
    k5 = conv_same(evo, params["w5"], params["b5"])
    cat = jnp.concatenate([evo, k3, k5], axis=2)
    K = cat @ params["wk"] + params["bk"]
    V = plm @ params["wv"] + params["bv"]
    qk = params["wq"].shape[1]
    scores = jnp.einsum("bld,bmd->blm", Q, K) * (1.0 / math.sqrt(qk))
    col = jnp.arange(scores.shape[-1])[None, None, :]
    scores = jnp.where(col < seqlens[:, None, None], scores, -1e6)
    atten = jax.nn.softmax(scores, axis=-1)
    return jnp.einsum("blm,bmd->bld", atten, V) + V


# ---------------------------------------------------------------------------
# Main
# ---------------------------------------------------------------------------
if __name__ == "__main__":
    # Small but lane-dense shapes (qk_dim == v_dim is required by the module's
    # cat/Linear dimensions; 128/256-wide outputs give unmasked full-lane stores).
    B, L = 4, 64
    q_input_dim, v_input_dim = 64, 256
    qk_dim = v_dim = 128

    key = jax.random.PRNGKey(0)
    keys = jax.random.split(key, 12)

    def init(k, shape, scale=0.1):
        return scale * jax.random.normal(k, shape, jnp.float32)

    params = {
        "wq": init(keys[0], (q_input_dim, qk_dim)),
        "bq": init(keys[1], (1, qk_dim)),
        "w3": init(keys[2], (3, q_input_dim, qk_dim)),
        "b3": init(keys[3], (1, qk_dim)),
        "w5": init(keys[4], (5, q_input_dim, qk_dim)),
        "b5": init(keys[5], (1, qk_dim)),
        "wk": init(keys[6], (q_input_dim + 2 * qk_dim, qk_dim)),
        "bk": init(keys[7], (1, qk_dim)),
        "wv": init(keys[8], (v_input_dim, v_dim)),
        "bv": init(keys[9], (1, v_dim)),
    }

    evo_local = jax.random.normal(keys[10], (B, L, q_input_dim), jnp.float32)
    plm_embedding = jax.random.normal(keys[11], (B, L, v_input_dim), jnp.float32)
    seqlengths = jnp.array([L, 40, 25, 7], dtype=jnp.int32)

    out = contextual_attention(plm_embedding, evo_local, seqlengths, params,
                               batch_block=2)
    out = jax.block_until_ready(out)

    ref = reference(plm_embedding, evo_local, seqlengths, params)
    assert out.shape == (B, L, v_dim)
    max_err = float(jnp.max(jnp.abs(out - ref)))
    # Tolerance relaxed vs bit-exact: host-side weight folding reorders the
    # f32 accumulation and the softmax uses the EUP approximate reciprocal.
    assert jnp.allclose(out, ref, atol=2e-2, rtol=2e-2), max_err

    print("KERNEL_OK")
</pallas_src>

<mosaic_0001>
module attributes {stable_mosaic.version = 11 : i64} {
  func.func @ctx_attn_kernel(%arg0: i32, %arg1: memref<2x1x1xi32, #tpu.memory_space<vmem>>, %arg2: memref<2x64x64xf32, #tpu.memory_space<vmem>>, %arg3: memref<2x64x256xf32, #tpu.memory_space<vmem>>, %arg4: memref<5x64x256xf32, #tpu.memory_space<vmem>>, %arg5: memref<1x256xf32, #tpu.memory_space<vmem>>, %arg6: memref<256x128xf32, #tpu.memory_space<vmem>>, %arg7: memref<1x128xf32, #tpu.memory_space<vmem>>, %arg8: memref<2x64x128xf32, #tpu.memory_space<vmem>>) attributes {dimension_semantics = [#tpu.dimension_semantics<parallel>], iteration_bounds = array<i64: 2>, scalar_prefetch = 0 : i64, scratch_operands = 0 : i64, tpu.core_type = #tpu.core_type<tc>, window_params = [{transform_indices = @transform_0, window_bounds = array<i64: 2, 1, 1>}, {transform_indices = @transform_1, window_bounds = array<i64: 2, 64, 64>}, {transform_indices = @transform_2, window_bounds = array<i64: 2, 64, 256>}, {pipeline_mode = #tpu.pipeline_mode<synchronous>, transform_indices = @transform_3, window_bounds = array<i64: 5, 64, 256>}, {pipeline_mode = #tpu.pipeline_mode<synchronous>, transform_indices = @transform_4, window_bounds = array<i64: 1, 256>}, {pipeline_mode = #tpu.pipeline_mode<synchronous>, transform_indices = @transform_5, window_bounds = array<i64: 256, 128>}, {pipeline_mode = #tpu.pipeline_mode<synchronous>, transform_indices = @transform_6, window_bounds = array<i64: 1, 128>}, {transform_indices = @transform_7, window_bounds = array<i64: 2, 64, 128>}]} {
    %c0 = arith.constant 0 : index
    %c0_0 = arith.constant 0 : index
    %c0_1 = arith.constant 0 : index
    %0 = vector.load %arg2[%c0, %c0_0, %c0_1] : memref<2x64x64xf32, #tpu.memory_space<vmem>>, vector<2x64x64xf32>
    %1 = vector.shape_cast %0 : vector<2x64x64xf32> to vector<128x64xf32>
    %c0_2 = arith.constant 0 : index
    %c0_3 = arith.constant 0 : index
    %c0_4 = arith.constant 0 : index
    %2 = vector.load %arg3[%c0_2, %c0_3, %c0_4] : memref<2x64x256xf32, #tpu.memory_space<vmem>>, vector<2x64x256xf32>
    %3 = vector.shape_cast %2 : vector<2x64x256xf32> to vector<128x256xf32>
    %c2 = arith.constant 2 : index
    %c0_5 = arith.constant 0 : index
    %c0_6 = arith.constant 0 : index
    %4 = vector.load %arg4[%c2, %c0_5, %c0_6] : memref<5x64x256xf32, #tpu.memory_space<vmem>>, vector<1x64x256xf32>
    %5 = vector.shape_cast %4 : vector<1x64x256xf32> to vector<64x256xf32>
    %cst = arith.constant dense<0.000000e+00> : vector<128x256xf32>
    %6 = tpu.matmul %1, %5, %cst {dimension_numbers = #tpu.dot_dimension_numbers<[1], [0], [0], [1], [0, 0, 1, 1], [], []>} : vector<128x64xf32>, vector<64x256xf32>, vector<128x256xf32> -> vector<128x256xf32>
    %7 = tpu.iota {dimensions = array<i32: 1>} : vector<2x64x64xi32>
    %8 = vector.shape_cast %7 : vector<2x64x64xi32> to vector<128x64xi32>
    %c2_i32 = arith.constant 2 : i32
    %9 = tpu.dynamic_rotate %1 by %c2_i32 dim 0 : vector<128x64xf32>, i32 -> vector<128x64xf32>
    %c2_i32_7 = arith.constant 2 : i32
    %10 = vector.broadcast %c2_i32_7 : i32 to vector<128x64xi32>
    %11 = arith.cmpi sge, %8, %10 : vector<128x64xi32>
    %cst_8 = arith.constant 0.000000e+00 : f32
    %12 = vector.broadcast %cst_8 : f32 to vector<128x64xf32>
    %13 = arith.select %11, %9, %12 : vector<128x64xi1>, vector<128x64xf32>
    %c0_9 = arith.constant 0 : index
    %c0_10 = arith.constant 0 : index
    %c0_11 = arith.constant 0 : index
    %14 = vector.load %arg4[%c0_9, %c0_10, %c0_11] : memref<5x64x256xf32, #tpu.memory_space<vmem>>, vector<1x64x256xf32>
    %15 = vector.shape_cast %14 : vector<1x64x256xf32> to vector<64x256xf32>
    %cst_12 = arith.constant dense<0.000000e+00> : vector<128x256xf32>
    %16 = tpu.matmul %13, %15, %cst_12 {dimension_numbers = #tpu.dot_dimension_numbers<[1], [0], [0], [1], [0, 0, 1, 1], [], []>} : vector<128x64xf32>, vector<64x256xf32>, vector<128x256xf32> -> vector<128x256xf32>
    %17 = arith.addf %6, %16 : vector<128x256xf32>
    %c1_i32 = arith.constant 1 : i32
    %18 = tpu.dynamic_rotate %1 by %c1_i32 dim 0 : vector<128x64xf32>, i32 -> vector<128x64xf32>
    %c1_i32_13 = arith.constant 1 : i32
    %19 = vector.broadcast %c1_i32_13 : i32 to vector<128x64xi32>
    %20 = arith.cmpi sge, %8, %19 : vector<128x64xi32>
    %cst_14 = arith.constant 0.000000e+00 : f32
    %21 = vector.broadcast %cst_14 : f32 to vector<128x64xf32>
    %22 = arith.select %20, %18, %21 : vector<128x64xi1>, vector<128x64xf32>
    %c1 = arith.constant 1 : index
    %c0_15 = arith.constant 0 : index
    %c0_16 = arith.constant 0 : index
    %23 = vector.load %arg4[%c1, %c0_15, %c0_16] : memref<5x64x256xf32, #tpu.memory_space<vmem>>, vector<1x64x256xf32>
    %24 = vector.shape_cast %23 : vector<1x64x256xf32> to vector<64x256xf32>
    %cst_17 = arith.constant dense<0.000000e+00> : vector<128x256xf32>
    %25 = tpu.matmul %22, %24, %cst_17 {dimension_numbers = #tpu.dot_dimension_numbers<[1], [0], [0], [1], [0, 0, 1, 1], [], []>} : vector<128x64xf32>, vector<64x256xf32>, vector<128x256xf32> -> vector<128x256xf32>
    %26 = arith.addf %17, %25 : vector<128x256xf32>
    %c127_i32 = arith.constant 127 : i32
    %27 = tpu.dynamic_rotate %1 by %c127_i32 dim 0 : vector<128x64xf32>, i32 -> vector<128x64xf32>
    %c63_i32 = arith.constant 63 : i32
    %28 = vector.broadcast %c63_i32 : i32 to vector<128x64xi32>
    %29 = arith.cmpi slt, %8, %28 : vector<128x64xi32>
    %cst_18 = arith.constant 0.000000e+00 : f32
    %30 = vector.broadcast %cst_18 : f32 to vector<128x64xf32>
    %31 = arith.select %29, %27, %30 : vector<128x64xi1>, vector<128x64xf32>
    %c3 = arith.constant 3 : index
    %c0_19 = arith.constant 0 : index
    %c0_20 = arith.constant 0 : index
    %32 = vector.load %arg4[%c3, %c0_19, %c0_20] : memref<5x64x256xf32, #tpu.memory_space<vmem>>, vector<1x64x256xf32>
    %33 = vector.shape_cast %32 : vector<1x64x256xf32> to vector<64x256xf32>
    %cst_21 = arith.constant dense<0.000000e+00> : vector<128x256xf32>
    %34 = tpu.matmul %31, %33, %cst_21 {dimension_numbers = #tpu.dot_dimension_numbers<[1], [0], [0], [1], [0, 0, 1, 1], [], []>} : vector<128x64xf32>, vector<64x256xf32>, vector<128x256xf32> -> vector<128x256xf32>
    %35 = arith.addf %26, %34 : vector<128x256xf32>
    %c126_i32 = arith.constant 126 : i32
    %36 = tpu.dynamic_rotate %1 by %c126_i32 dim 0 : vector<128x64xf32>, i32 -> vector<128x64xf32>
    %c62_i32 = arith.constant 62 : i32
    %37 = vector.broadcast %c62_i32 : i32 to vector<128x64xi32>
    %38 = arith.cmpi slt, %8, %37 : vector<128x64xi32>
    %cst_22 = arith.constant 0.000000e+00 : f32
    %39 = vector.broadcast %cst_22 : f32 to vector<128x64xf32>
    %40 = arith.select %38, %36, %39 : vector<128x64xi1>, vector<128x64xf32>
    %c4 = arith.constant 4 : index
    %c0_23 = arith.constant 0 : index
    %c0_24 = arith.constant 0 : index
    %41 = vector.load %arg4[%c4, %c0_23, %c0_24] : memref<5x64x256xf32, #tpu.memory_space<vmem>>, vector<1x64x256xf32>
    %42 = vector.shape_cast %41 : vector<1x64x256xf32> to vector<64x256xf32>
    %cst_25 = arith.constant dense<0.000000e+00> : vector<128x256xf32>
    %43 = tpu.matmul %40, %42, %cst_25 {dimension_numbers = #tpu.dot_dimension_numbers<[1], [0], [0], [1], [0, 0, 1, 1], [], []>} : vector<128x64xf32>, vector<64x256xf32>, vector<128x256xf32> -> vector<128x256xf32>
    %44 = arith.addf %35, %43 : vector<128x256xf32>
    %c0_26 = arith.constant 0 : index
    %c0_27 = arith.constant 0 : index
    %45 = vector.load %arg5[%c0_26, %c0_27] : memref<1x256xf32, #tpu.memory_space<vmem>>, vector<1x256xf32>
    %46 = vector.broadcast %45 : vector<1x256xf32> to vector<128x256xf32>
    %47 = arith.addf %44, %46 : vector<128x256xf32>
    %48 = vector.extract_strided_slice %47 {offsets = [0, 0], sizes = [128, 128], strides = [1, 1]} : vector<128x256xf32> to vector<128x128xf32>
    %49 = vector.shape_cast %48 : vector<128x128xf32> to vector<2x64x128xf32>
    %50 = vector.extract_strided_slice %47 {offsets = [0, 128], sizes = [128, 128], strides = [1, 1]} : vector<128x256xf32> to vector<128x128xf32>
    %51 = vector.shape_cast %50 : vector<128x128xf32> to vector<2x64x128xf32>
    %c0_28 = arith.constant 0 : index
    %c0_29 = arith.constant 0 : index
    %52 = vector.load %arg6[%c0_28, %c0_29] : memref<256x128xf32, #tpu.memory_space<vmem>>, vector<256x128xf32>
    %cst_30 = arith.constant dense<0.000000e+00> : vector<128x128xf32>
    %53 = tpu.matmul %3, %52, %cst_30 {dimension_numbers = #tpu.dot_dimension_numbers<[1], [0], [0], [1], [0, 0, 1, 1], [], []>} : vector<128x256xf32>, vector<256x128xf32>, vector<128x128xf32> -> vector<128x128xf32>
    %c0_31 = arith.constant 0 : index
    %c0_32 = arith.constant 0 : index
    %54 = vector.load %arg7[%c0_31, %c0_32] : memref<1x128xf32, #tpu.memory_space<vmem>>, vector<1x128xf32>
    %55 = vector.broadcast %54 : vector<1x128xf32> to vector<128x128xf32>
    %56 = arith.addf %53, %55 : vector<128x128xf32>
    %57 = vector.shape_cast %56 : vector<128x128xf32> to vector<2x64x128xf32>
    "tpu.trace_start"() <{level = 10 : i32, message = "bqd,bkd->bqk"}> : () -> ()
    %cst_33 = arith.constant dense<0.000000e+00> : vector<2x64x64xf32>
    %58 = tpu.matmul %49, %51, %cst_33 {dimension_numbers = #tpu.dot_dimension_numbers<[2], [2], [1], [1], [0, 0, 0, 1, 1, 1], [0], [0]>} : vector<2x64x128xf32>, vector<2x64x128xf32>, vector<2x64x64xf32> -> vector<2x64x64xf32>
    "tpu.trace_stop"() : () -> ()
    %59 = tpu.iota {dimensions = array<i32: 2>} : vector<2x64x64xi32>
    %c0_34 = arith.constant 0 : index
    %c0_35 = arith.constant 0 : index
    %c0_36 = arith.constant 0 : index
    %60 = vector.load %arg1[%c0_34, %c0_35, %c0_36] : memref<2x1x1xi32, #tpu.memory_space<vmem>>, vector<2x1x1xi32>
    %61 = vector.broadcast %60 : vector<2x1x1xi32> to vector<2x64x64xi32>
    %62 = arith.cmpi slt, %59, %61 : vector<2x64x64xi32>
    %cst_37 = arith.constant -1.000000e+06 : f32
    %63 = vector.broadcast %cst_37 : f32 to vector<2x64x64xf32>
    %64 = arith.select %62, %58, %63 : vector<2x64x64xi1>, vector<2x64x64xf32>
    %cst_38 = arith.constant dense<0xFF800000> : vector<2x64xf32>
    %65 = vector.multi_reduction <maximumf>, %64, %cst_38 [2] : vector<2x64x64xf32> to vector<2x64xf32>
    %66 = vector.shape_cast %65 : vector<2x64xf32> to vector<2x64x1xf32>
    %67 = vector.broadcast %66 : vector<2x64x1xf32> to vector<2x64x64xf32>
    %68 = arith.subf %64, %67 : vector<2x64x64xf32>
    %69 = math.exp %68 : vector<2x64x64xf32>
    %cst_39 = arith.constant dense<0.000000e+00> : vector<2x64xf32>
    %70 = vector.multi_reduction <add>, %69, %cst_39 [2] : vector<2x64x64xf32> to vector<2x64xf32>
    %71 = vector.shape_cast %70 : vector<2x64xf32> to vector<2x64x1xf32>
    %72 = tpu.reciprocal %71 {approx = true} : vector<2x64x1xf32> -> vector<2x64x1xf32>
    %73 = vector.broadcast %72 : vector<2x64x1xf32> to vector<2x64x64xf32>
    %74 = arith.mulf %69, %73 : vector<2x64x64xf32>
    "tpu.trace_start"() <{level = 10 : i32, message = "bqk,bkd->bqd"}> : () -> ()
    %cst_40 = arith.constant dense<0.000000e+00> : vector<2x64x128xf32>
    %75 = tpu.matmul %74, %57, %cst_40 {dimension_numbers = #tpu.dot_dimension_numbers<[2], [1], [1], [2], [0, 0, 0, 1, 1, 2], [0], [0]>} : vector<2x64x64xf32>, vector<2x64x128xf32>, vector<2x64x128xf32> -> vector<2x64x128xf32>
    "tpu.trace_stop"() : () -> ()
    %76 = arith.addf %75, %57 : vector<2x64x128xf32>
    %c0_41 = arith.constant 0 : index
    %c0_42 = arith.constant 0 : index
    %c0_43 = arith.constant 0 : index
    %77 = vector.load %arg8[%c0_41, %c0_42, %c0_43] : memref<2x64x128xf32, #tpu.memory_space<vmem>>, vector<2x64x128xf32>
    tpu.vector_store %arg8[%c0_41, %c0_42, %c0_43], %76 {strides = array<i32>} : memref<2x64x128xf32, #tpu.memory_space<vmem>>, vector<2x64x128xf32>,
    return
  }
  func.func @transform_0(%arg0: i32) -> (i32, i32, i32) {
    %c0_i32 = arith.constant 0 : i32
    %c0_i32_0 = arith.constant 0 : i32
    %c0_i32_1 = arith.constant 0 : i32
    return %arg0, %c0_i32, %c0_i32_0 : i32, i32, i32
  }
  func.func @transform_1(%arg0: i32) -> (i32, i32, i32) {
    %c0_i32 = arith.constant 0 : i32
    %c0_i32_0 = arith.constant 0 : i32
    %c0_i32_1 = arith.constant 0 : i32
    return %arg0, %c0_i32, %c0_i32_0 : i32, i32, i32
  }
  func.func @transform_2(%arg0: i32) -> (i32, i32, i32) {
    %c0_i32 = arith.constant 0 : i32
    %c0_i32_0 = arith.constant 0 : i32
    %c0_i32_1 = arith.constant 0 : i32
    return %arg0, %c0_i32, %c0_i32_0 : i32, i32, i32
  }
  func.func @transform_3(%arg0: i32) -> (i32, i32, i32) {
    %c0_i32 = arith.constant 0 : i32
    %c0_i32_0 = arith.constant 0 : i32
    %c0_i32_1 = arith.constant 0 : i32
    %c0_i32_2 = arith.constant 0 : i32
    return %c0_i32, %c0_i32_0, %c0_i32_1 : i32, i32, i32
  }
  func.func @transform_4(%arg0: i32) -> (i32, i32) {
    %c0_i32 = arith.constant 0 : i32
    %c0_i32_0 = arith.constant 0 : i32
    %c0_i32_1 = arith.constant 0 : i32
    return %c0_i32, %c0_i32_0 : i32, i32
  }
  func.func @transform_5(%arg0: i32) -> (i32, i32) {
    %c0_i32 = arith.constant 0 : i32
    %c0_i32_0 = arith.constant 0 : i32
    %c0_i32_1 = arith.constant 0 : i32
    return %c0_i32, %c0_i32_0 : i32, i32
  }
  func.func @transform_6(%arg0: i32) -> (i32, i32) {
    %c0_i32 = arith.constant 0 : i32
    %c0_i32_0 = arith.constant 0 : i32
    %c0_i32_1 = arith.constant 0 : i32
    return %c0_i32, %c0_i32_0 : i32, i32
  }
  func.func @transform_7(%arg0: i32) -> (i32, i32, i32) {
    %c0_i32 = arith.constant 0 : i32
    %c0_i32_0 = arith.constant 0 : i32
    %c0_i32_1 = arith.constant 0 : i32
    return %arg0, %c0_i32, %c0_i32_0 : i32, i32, i32
  }
}

</mosaic_0001>

<bundles_post_ra>
// kernel: tpu_custom_call.1
= control target key start
LH: loop header
LB: loop body
LE: loop exit
PB: predicated region body
PF: predicated region fallthrough
CT: control target
= control target key end

     0   :  { %s5328_s0 = inlined_call_operand.vmem [shape: s32[4,1,1], index: 0, kind: input, shape index: {}]   ;;  %s5329_s1 = inlined_call_operand.hbm [shape: f32[4,64,64], index: 1, kind: input, shape index: {}]   ;;  %s5330_s2 = inlined_call_operand.hbm [shape: f32[4,64,256], index: 2, kind: input, shape index: {}]   ;;  %s5331_s3 = inlined_call_operand.hbm [shape: f32[5,64,256], index: 3, kind: input, shape index: {}]   ;;  %s5332_s4 = inlined_call_operand.vmem [shape: f32[1,256], index: 4, kind: input, shape index: {}]   ;;  %s5333_s5 = inlined_call_operand.hbm [shape: f32[256,128], index: 5, kind: input, shape index: {}]   ;;  %s5334_s6 = inlined_call_operand.vmem [shape: f32[1,128], index: 6, kind: input, shape index: {}]   ;;  %s5335_s7 = inlined_call_operand.hbm [shape: f32[4,64,128], index: 7, kind: output, shape index: {}]  }
   0x1   :  { %5345 = sst [smem:[#allocation18_spill]] %s5329_s1 }
   0x2   :  { %5346 = sst [smem:[#allocation19_spill]] %s5331_s3 }
   0x3   :  { %5347 = sst [smem:[#allocation20_spill]] %s5333_s5 }
   0x4   :  { %12 = vsyncpa [#allocation3], 0 }
   0x5   :  { %14 = vsyncpa [#allocation3 + $0x1], 0 }
   0x6   :  { %15 = vsyncpa [#allocation6], 0 }
   0x7   :  { %17 = vsyncpa [#allocation6 + $0x1], 0 }
   0x8   :  { %18 = vsyncpa [#allocation9], 0 }
   0x9   :  { %19 = vsyncpa [#allocation4], 0 }
   0xa   :  { %21 = vsyncpa [#allocation4 + $0x1], 0  ;;  %s3735_s24 = smov 0   ;;  %s3737_s25 = smov 0  }
   0xb   :  { %s3739_s26 = smov 0   ;;  %s3741_s27 = smov 0  }
   0xc LB: > { %5348 = sst [smem:[#allocation16_spill]] %s3676_s26  ;;  %s3756_s28 = sadd.s32 4294967295, %s3680_s27   ;;  %s3680_s27 = sphi %s3741_s27, %s5382_s27   ;;  %s3676_s26 = sphi %s3739_s26, %s5379_s26   ;;  %s3672_s25 = sphi %s3737_s25, %s5381_s25   ;;  %s3668_s24 = sphi %s3735_s24, %s5380_s24  }
   0xd   : > { %s2964_s29 = sadd.s32 4294967294, %s3680_s27   ;;  %p73_p0 = scmp.ne.s32.totalorder %s3672_s25, %s3668_s24 }
   0xe   : > { %p5340_p1 = scmp.eq.s32.totalorder %s3756_s28, 0  ;;  %p207_p2 = scmp.eq.s32.totalorder %s3756_s28, 1 }
   0xf   : > { %p213_p3 = scmp.eq.s32.totalorder %s2964_s29, 1  ;;  %p2965_p5 = scmp.ge.s32.totalorder %s3680_s27, 1 }
  0x10   : > { %p3765_p4 = por %p5340_p1, %p73_p0  ;;  %p220_p7 = scmp.lt.s32.totalorder %s3680_s27, 3 }
  0x11   : > { %p3770_p6 = por %p213_p3, %p73_p0  ;;  %s3682_s10 = smov [#allocation7]  }
  0x12   : > { %s5349_s30 = scalar_select %p3765_p4, 1, 0 }
  0x13   : > { %s5350_s8 = scalar_select %p3770_p6, 1, 0 }
  0x14   : > { %p3775_p8 = pnand %p2965_p5, %p220_p7  ;;  %s232_s11 = sshll.u32 %s3682_s10, 4  ;;  %s233_s11 = int_to_ptr.vmem [resolvable:$true] %s232_s11 }
  0x15   : > { %s3683_s13 = smov [#allocation8]   ;;  %s3507_s15 = scalar_lea.vmem %s233_s11, 10240 }
  0x16   : > { %p3365_p9 = pneg %p3775_p8  ;;  %s248_s14 = sshll.u32 %s3683_s13, 4  ;;  %s249_s14 = int_to_ptr.vmem [resolvable:$true] %s248_s14 }
  0x17   : > { %p3508_p13 = scmp.ne.s32.totalorder %s233_s11, %s3507_s15  ;;  %p3515_p5 = scmp.lt.s32.totalorder %s233_s11, %s233_s11 }
  0x18   : > { %p3784_p11 = pnand %p3365_p9, %p5340_p1  ;;  %p3516_p7 = scmp.lt.s32.totalorder %s3507_s15, %s3507_s15 }
  0x1a   : > { %p3498_p12 = pneg %p3784_p11  ;;  %p3517_p10 = por %p3516_p7, %p3515_p5 }
  0x1c   : > { %p3510_p0 = pnand %p3508_p13, %p3498_p12 }
  0x1e   : > { %p3511_p3 = pneg %p3510_p0 }
  0x20   : > { %p3518_p9 = pnand %p3517_p10, %p3511_p3 }
  0x22   : > { %3521 = shalt.err (!%p3518_p9)
}
  0x23   : > { %s5336_s16 = smov 256   ;;  %s5337_s17 = smov 16  }
  0x24   : > { %s5353_s3 = sld [smem:[#allocation19_spill]]  ;;  %s3533_s20 = scalar_lea.vmem %s249_s14, 4096 }
  0x25   : > { %p3534_p13 = scmp.ne.s32.totalorder %s249_s14, %s3533_s20  ;;  %p3541_p10 = scmp.lt.s32.totalorder %s249_s14, %s249_s14 }
  0x26   : > { %p3542_p3 = scmp.lt.s32.totalorder %s3533_s20, %s3533_s20 }
  0x27   : > { %p3536_p0 = pnand %p3534_p13, %p3498_p12 }
  0x28   : > { %p3543_p7 = por %p3542_p3, %p3541_p10 }
  0x29   : > { %p3537_p5 = pneg %p3536_p0 }
  0x2a   : > { %3368 = dma.hbm_to_vmem [thread:$0]  (!%p3784_p11), %s5353_s3, 10240, %s233_s11, [#allocation6], %s5336_s16, %s5336_s16, %s5337_s17  }
  0x2b   : > { %p3544_p9 = pnand %p3543_p7, %p3537_p5 }
  0x2d   : > { %3547 = shalt.err (!%p3544_p9)
}
  0x2e   : > { %s5338_s21 = smov 128   ;;  %s5339_s22 = smov 8  }
  0x2f   : > { %s5354_s5 = sld [smem:[#allocation20_spill]]  ;;  %s3813_s10 = sadd.s32 1, %s3680_s27  }
  0x30   : > { %s57_s11 = ssub.s32 %s3680_s27, %s3813_s10  ;;  %s60_s13 = sadd.s32 1, %s3676_s26 }
  0x31   : > { %p58_p12 = scmp.eq.s32.totalorder %s57_s11, 0  ;;  %p67_p13 = scmp.ne.s32.totalorder %s3676_s26, %s3672_s25 }
  0x32   : > { %p68_p0 = scmp.eq.s32.totalorder %s3680_s27, 0  ;;  %p3385_p3 = scmp.lt.s32.totalorder %s3680_s27, 2 }
  0x33   : > { %s3822_s15 = scalar_select %p58_p12, %s3676_s26, %s60_s13  }
  0x34   : > { %p69_p5 = por %p68_p0, %p67_p13  ;;  %p3826_p10 = por %p207_p2, %p67_p13 }
  0x35   : > { %3371 = dma.hbm_to_vmem [thread:$0]  (!%p3784_p11), %s5354_s5, 4096, %s249_s14, [#allocation9], %s5338_s21, %s5338_s21, %s5339_s22  }
  0x36   : > { %5355 = sst [smem:[#allocation17_spill]] %s3822_s15  ;;  %s3832_s18 = sand.u32 1, %s3676_s26  }
  0x37   : > { %s5356_s12 = scalar_select %p3826_p10, 1, 0 }
  0x38   : > { %s2969_s14 = sshll.u32 %s3832_s18, 7  ;;  %s3090_s19 = sshll.u32 %s3680_s27, 11 }
  0x39   : > { %s5357_s1 = sld [smem:[#allocation18_spill]]  ;;  %s277_s11 = scalar_lea.vmem [#allocation2], %s2969_s14 }
  0x3a   : > { %s285_s13 = sshll.u32 %s277_s11, 4  ;;  %p3843_p2 = pnand %p3385_p3, %p69_p5  ;;  %s3841_s13 = int_to_ptr.vmem [resolvable:$true] %s285_s13 }
  0x3b   : > { %s274_s22 = scalar_lea.sflag [#allocation3], %s3832_s18 }
  0x3c   : > { %p3550_p7 = pneg %p3843_p2 }
  0x3f   : > { %s3839_s29 = scalar_lea.hbm %s5357_s1, %s3090_s19  ;;  %s3553_s20 = scalar_lea.hbm %s5357_s1, 4096 }
  0x40   : > { %s3548_s3 = scalar_lea.hbm %s3839_s29, 2048  ;;  %p3554_p13 = scmp.lt.s32.totalorder %s3839_s29, %s5357_s1 }
  0x41   : > { %p3549_p11 = scmp.ne.s32.totalorder %s3839_s29, %s3548_s3  ;;  %p3555_p0 = scmp.lt.s32.totalorder %s3553_s20, %s3548_s3 }
  0x43   : > { %p3551_p9 = pnand %p3550_p7, %p3549_p11  ;;  %p3556_p5 = por %p3555_p0, %p3554_p13 }
  0x45   : > { %p3552_p12 = pneg %p3551_p9 }
  0x47   : > { %p3557_p3 = pnand %p3556_p5, %p3552_p12 }
  0x49   : > { %3560 = shalt.err (!%p3557_p3)
}
  0x4a   : > { %s3561_s17 = scalar_lea.vmem %s3841_s13, 2048  ;;  %s3688_s14 = smov [#allocation2]  }
  0x4b   : > { %p3562_p1 = scmp.ne.s32.totalorder %s3841_s13, %s3561_s17  ;;  %s3566_s19 = sshll.u32 %s3688_s14, 4  ;;  %s3567_s19 = int_to_ptr.vmem [resolvable:$false] %s3566_s19 }
  0x4c   : > { %s3568_s21 = scalar_lea.vmem %s3567_s19, 4096  ;;  %p3569_p6 = scmp.lt.s32.totalorder %s3841_s13, %s3567_s19 }
  0x4d   : > { %p3564_p11 = pnand %p3562_p1, %p3550_p7  ;;  %p3570_p10 = scmp.lt.s32.totalorder %s3568_s21, %s3561_s17 }
  0x4f   : > { %p3565_p9 = pneg %p3564_p11  ;;  %p3571_p4 = por %p3570_p10, %p3569_p6 }
  0x51   : > { %p3572_p13 = pnand %p3571_p4, %p3565_p9 }
  0x53   : > { %3575 = shalt.err (!%p3572_p13)
}
  0x54   : > { %s5359_s3 = smov 8   ;;  %s5360_s20 = smov 128  }
  0x55   : > { %3375 = dma.hbm_to_vmem [thread:$0]  (!%p3843_p2), %s3839_s29, 2048, %s3841_s13, %s274_s22, %s5360_s20, %s5360_s20, %s5359_s3  }
  0x56   : > { %s3092_s23 = sshll.u32 %s3680_s27, 12  ;;  %s5361_s14 = sshll.u32 %s3832_s18, 8 }
  0x57   : > { %s3883_s21 = scalar_lea.hbm %s5330_s2, %s3092_s23  ;;  %s299_s19 = scalar_lea.vmem [#allocation5], %s5361_s14 }
  0x58   : > { %s307_s1 = sshll.u32 %s299_s19, 4  ;;  %s5362_s5 = sand.u32 1, %s3680_s27   ;;  %s3887_s1 = int_to_ptr.vmem [resolvable:$true] %s307_s1 }
  0x59   : > { %s296_s15 = scalar_lea.sflag [#allocation6], %s5362_s5  ;;  %s3576_s26 = scalar_lea.hbm %s3883_s21, 4096 }
  0x5a   : > { %p3577_p1 = scmp.ne.s32.totalorder %s3883_s21, %s3576_s26  ;;  %s3581_s13 = scalar_lea.hbm %s5330_s2, 8192 }
  0x5b   : > { %p3582_p10 = scmp.lt.s32.totalorder %s3883_s21, %s5330_s2  ;;  %p3583_p12 = scmp.lt.s32.totalorder %s3581_s13, %s3576_s26 }
  0x5c   : > { %p3579_p4 = pnand %p3577_p1, %p3550_p7 }
  0x5d   : > { %p3584_p0 = por %p3583_p12, %p3582_p10 }
  0x5e   : > { %p3580_p6 = pneg %p3579_p4 }
  0x60   : > { %p3585_p5 = pnand %p3584_p0, %p3580_p6 }
  0x62   : > { %3588 = shalt.err (!%p3585_p5)
}
  0x63   : > { %s3589_s5 = scalar_lea.vmem %s3887_s1, 4096  ;;  %s3689_s20 = smov [#allocation5]  }
  0x64   : > { %p3590_p3 = scmp.ne.s32.totalorder %s3887_s1, %s3589_s5  ;;  %s3594_s23 = sshll.u32 %s3689_s20, 4  ;;  %s3595_s23 = int_to_ptr.vmem [resolvable:$false] %s3594_s23 }
  0x65   : > { %s3596_s11 = scalar_lea.vmem %s3595_s23, 8192  ;;  %p3597_p13 = scmp.lt.s32.totalorder %s3887_s1, %s3595_s23 }
  0x66   : > { %p3592_p11 = pnand %p3590_p3, %p3550_p7  ;;  %p3598_p1 = scmp.lt.s32.totalorder %s3596_s11, %s3589_s5 }
  0x68   : > { %p3593_p9 = pneg %p3592_p11  ;;  %p3599_p4 = por %p3598_p1, %p3597_p13 }
  0x6a   : > { %p3600_p10 = pnand %p3599_p4, %p3593_p9 }
  0x6c   : > { %3603 = shalt.err (!%p3600_p10)
}
  0x6d   : > { %s5363_s26 = smov 16   ;;  %s5364_s17 = smov 256  }
  0x6e   : > { %3378 = dma.hbm_to_vmem [thread:$0]  (!%p3843_p2), %s3883_s21, 4096, %s3887_s1, %s296_s15, %s5364_s17, %s5364_s17, %s5363_s26  }
  0x6f   : > { %319 = sbr.rel (%p3775_p8) target bundleno = 1309 (0x51d), region = 48  ;;  %s3919_s14 = sand.u32 (!%p3775_p8), 1, %s3672_s25  }
  0x70   : > { %s2978_s19 = sshll.u32 (!%p3775_p8), %s3919_s14, 7  ;;  %s322_s22 = scalar_lea.sflag (!%p3775_p8), [#allocation3], %s3919_s14 }
  0x71   : > { %s3925_s16 = scalar_lea.vmem (!%p3775_p8), [#allocation2], %s2978_s19  ;;  %p5365_p7 = scmp.ne.s32.totalorder (!%p3775_p8), %s5349_s30, 0 }
  0x74   : > { %3647 = dma.done.wait (%p5365_p7), %s322_s22, 2048  }
  0x75   : > { %3649 = vsyncadd (%p5365_p7), %s322_s22, 4294965248  ;;  %s330_s1 = sand.u32 1, %s3756_s28   ;;  %s2979_s9 = sshll.u32 %s3919_s14, 8 }
  0x76   : > { %s331_s15 = scalar_lea.sflag [#allocation6], %s330_s1  ;;  %s3933_s21 = scalar_lea.vmem [#allocation5], %s2979_s9 }
  0x77   : > { %3651 = dma.done.wait (%p5365_p7), %s331_s15, 4096  }
  0x78   : > { %3653 = vsyncadd (%p5365_p7), %s331_s15, 4294963200  ;;  %p5366_p8 = scmp.eq.s32.totalorder %s3756_s28, 0 }
  0x7a   : > { %3655 = dma.done.wait (%p5366_p8), [#allocation6], 10240   ;;  %p5367_p2 = pmov %p5366_p8 }
  0x7c   : > { %3657 = vsyncadd (%p5367_p2), [#allocation6], 4294957056  ;;  %p5368_p6 = pmov %p5367_p2 }
  0x7d   : > { %p5369_p12 = pmov %p5367_p2 }
  0x7e   : > { %3659 = dma.done.wait (%p5368_p6), [#allocation9], 4096  }
  0x7f   : > { %3661 = vsyncadd (%p5369_p12), [#allocation9], 4294963200  ;;  %v3690_v0 = vmov 0.0   ;;  %v536_v1 = vld [vmem:[#allocation7 + $0x78] sm:$0xff]  ;;  %v535_v3 = vld [vmem:[#allocation7 + $0x70] sm:$0xff]  ;;  %v5344_v13 = vlaneseq  ;;  %vm537_vm2 = vcmask 523264  }
  0x80   : > { %650 = vmatprep.mubr.f32.mxu0 %v3690_v0  ;;  %859 = vmatprep.mubr.f32.mxu1 %v3690_v0  ;;  %v454_v2 = vld [vmem:[#allocation7 + $0x178] sm:$0xff]  ;;  %v453_v4 = vld [vmem:[#allocation7 + $0x170] sm:$0xff]  ;;  %v534_v5 = vld [vmem:[#allocation7 + $0x68] sm:$0xff]  ;;  %s2983_s30 = sshll.u32 %s3756_s28, 1  ;;  %s5245_s11 = scalar_lea.vmem [#allocation10], %s2978_s19 }
  0x81   : > { %602 = vmatprep.subr.mxu0 %v536_v1  ;;  %811 = vmatprep.subr.mxu1 %v454_v2  ;;  %v452_v6 = vld [vmem:[#allocation7 + $0x168] sm:$0xff]  ;;  %v533_v7 = vld [vmem:[#allocation7 + $0x60] sm:$0xff]  ;;  %v532_v9 = vld [vmem:[#allocation7 + $0x58] sm:$0xff]  ;;  %v3950_v22 = vshrl.u32 %v5344_v13, 7  ;;  %p383_p0 = scmp.lt.s32.totalorder %s2983_s30, 3  ;;  %s3094_s26 = sshll.u32 %s3756_s28, 11 }
  0x82   : > { %603 = vmatpush1.msra.mxu0 %v535_v3  ;;  %812 = vmatpush1.msra.mxu1 %v453_v4  ;;  %v451_v8 = vld [vmem:[#allocation7 + $0x160] sm:$0xff]  ;;  %v450_v10 = vld [vmem:[#allocation7 + $0x158] sm:$0xff]  ;;  %v531_v11 = vld [vmem:[#allocation7 + $0x50] sm:$0xff]  ;;  %s2840_s17 = sshll.u32 %s5245_s11, 4  ;;  %s2826_s28 = scalar_lea.sflag [#allocation4], %s3919_s14  ;;  %s5282_s17 = int_to_ptr.vmem [resolvable:$true] %s2840_s17 }
  0x83   : > { %604 = vmatprep.subr.mxu0 %v534_v5  ;;  %813 = vmatprep.subr.mxu1 %v452_v6  ;;  %v449_v12 = vld [vmem:[#allocation7 + $0x150] sm:$0xff]  ;;  %v530_v14 = vld [vmem:[#allocation7 + $0x48] sm:$0xff]  ;;  %v529_v16 = vld [vmem:[#allocation7 + $0x40] sm:$0xff]  ;;  %vm480_vm0 = vcmp.lt.s32.totalorder %v3950_v22, 2  ;;  %vm497_vm1 = vcmp.ge.s32.totalorder %v3950_v22, 2  ;;  %vm972_vm3 = vcmp.lt.s32.totalorder %v3950_v22, 1 }
  0x84   : > { %605 = vmatpush1.msra.mxu0 %v533_v7  ;;  %814 = vmatpush1.msra.mxu1 %v451_v8  ;;  %v448_v15 = vld [vmem:[#allocation7 + $0x148] sm:$0xff]  ;;  %v447_v17 = vld [vmem:[#allocation7 + $0x140] sm:$0xff]  ;;  %v528_v18 = vld [vmem:[#allocation7 + $0x38] sm:$0xff]  ;;  %vm989_vm4 = vcmp.ge.s32.totalorder %v3950_v22, 1  ;;  %vm1287_vm5 = vcmp.lt.s32.totalorder %v3950_v22, 7  ;;  %vm1602_vm7 = vcmp.lt.s32.totalorder %v3950_v22, 6 }
  0x85   : > { %606 = vmatprep.subr.mxu0 %v532_v9  ;;  %815 = vmatprep.subr.mxu1 %v450_v10  ;;  %v446_v19 = vld [vmem:[#allocation7 + $0x138] sm:$0xff]  ;;  %v527_v20 = vld [vmem:[#allocation7 + $0x30] sm:$0xff]  ;;  %v526_v23 = vld [vmem:[#allocation7 + $0x28] sm:$0xff]  ;;  %s5384_s30 = smov (!%p383_p0, %s2983_s30), 3  ;;  %s3604_s1 = scalar_lea.vmem %s5282_s17, 2048 }
  0x86   : > { %607 = vmatpush1.msra.mxu0 %v531_v11  ;;  %816 = vmatpush1.msra.mxu1 %v449_v12  ;;  %v445_v21 = vld [vmem:[#allocation7 + $0x130] sm:$0xff]  ;;  %v444_v24 = vld [vmem:[#allocation7 + $0x128] sm:$0xff]  ;;  %v525_v25 = vld [vmem:[#allocation7 + $0x20] sm:$0xff]  ;;  %s385_s18 = scalar_lea.vmem %s5328_s0, %s5384_s30  ;;  %p3605_p5 = scmp.ne.s32.totalorder %s5282_s17, %s3604_s1 }
  0x87   : > { %608 = vmatprep.subr.mxu0 %v530_v14  ;;  %817 = vmatprep.subr.mxu1 %v448_v15  ;;  %v443_v26 = vld [vmem:[#allocation7 + $0x120] sm:$0xff]  ;;  %v524_v27 = vld [vmem:[#allocation7 + $0x18] sm:$0xff]  ;;  %v523_v29 = vld [vmem:[#allocation7 + $0x10] sm:$0xff]  ;;  %p5375_p3 = scmp.ne.s32.totalorder %s5356_s12, 0  ;;  %s3692_s9 = smov [#allocation10]  }
  0x88   : > { %609 = vmatpush1.msra.mxu0 %v529_v16  ;;  %818 = vmatpush1.msra.mxu1 %v447_v17  ;;  %v442_v28 = vld [vmem:[#allocation7 + $0x118] sm:$0xff]  ;;  %v3953_v30 = vld [vmem:[%s3925_s16] sm:$0xff]  ;;  %v441_v31 = vld [vmem:[#allocation7 + $0x110] sm:$0xff]  ;;  %s3608_s15 = sshll.u32 %s3692_s9, 4  ;;  %s3609_s15 = int_to_ptr.vmem [resolvable:$false] %s3608_s15 }
  0x89   : > { %610 = vmatprep.subr.mxu0 %v528_v18  ;;  %819 = vmatprep.subr.mxu1 %v446_v19  ;;  %v3956_v32 = vld [vmem:[%s3925_s16 + $0x78] sm:$0xff]  ;;  %v464_v33 = vrot.slane %v3953_v30, 6  ;;  %v3961_v34 = vld [vmem:[%s3925_s16 + $0x8] sm:$0xff]  ;;  %v521_v38 = vld [vmem:[#allocation7] sm:$0xff]  ;;  %v956_v45 = vrot.slane %v3953_v30, 7  ;;  %v1271_v52 = vrot.slane %v3953_v30, 1  ;;  %p3606_p11 = pnand %p3605_p5, %p5375_p3  ;;  %p3611_p13 = scmp.lt.s32.totalorder %s5282_s17, %s3609_s15 }
  0x8a   : > { %611 = vmatpush1.msra.mxu0 %v527_v20  ;;  %820 = vmatpush1.msra.mxu1 %v445_v21  ;;  %v522_v35 = vld [vmem:[#allocation7 + $0x8] sm:$0xff]  ;;  %v479_v37 = vrot.slane %v3956_v32, 6  ;;  %v439_v39 = vld [vmem:[#allocation7 + $0x100] sm:$0xff]  ;;  %v465_v41 = vrot.slane %v3961_v34, 6  ;;  %v3973_v43 = vld [vmem:[%s3925_s16 + $0x10] sm:$0xff]  ;;  %v971_v51 = vrot.slane %v3956_v32, 7 }
  0x8b   : > { %612 = vmatprep.subr.mxu0 %v526_v23  ;;  %821 = vmatprep.subr.mxu1 %v444_v24  ;;  %v440_v36 = vld [vmem:[#allocation7 + $0x108] sm:$0xff]  ;;  %v1029_v44 = vld [vmem:[#allocation7 + $0xf8] sm:$0xff]  ;;  %v1028_v46 = vld [vmem:[#allocation7 + $0xf0] sm:$0xff]  ;;  %v466_v48 = vrot.slane %v3973_v43, 6  ;;  %v1272_v57 = vrot.slane %v3961_v34, 1  ;;  %v957_v61 = vrot.slane %v3961_v34, 7  ;;  %p3607_p9 = pneg %p3606_p11 }
  0x8c   : > { %613 = vmatpush1.msra.mxu0 %v525_v25  ;;  %822 = vmatpush1.msra.mxu1 %v443_v26  ;;  %v496_v40 = vsel %vm480_vm0, %v479_v37, %v464_v33  ;;  %v495_v47 = vsel %vm480_vm0, %v464_v33, %v465_v41  ;;  %v1344_v49 = vld [vmem:[#allocation7 + $0x1f8] sm:$0xff]  ;;  %v1343_v50 = vld [vmem:[#allocation7 + $0x1f0] sm:$0xff]  ;;  %v1027_v54 = vld [vmem:[#allocation7 + $0xe8] sm:$0xff]  ;;  %v988_v56 = vsel %vm972_vm3, %v971_v51, %v956_v45  ;;  %v958_v2 = vrot.slane %v3973_v43, 7 }
  0x8d   : > { %614 = vmatprep.subr.mxu0 %v524_v27  ;;  %823 = vmatprep.subr.mxu1 %v442_v28  ;;  %v505_v42 = vsel %vm497_vm1, %v496_v40, 0.0  ;;  %v3989_v53 = vld [vmem:[%s3925_s16 + $0x18] sm:$0xff]  ;;  %v1342_v55 = vld [vmem:[#allocation7 + $0x1e8] sm:$0xff]  ;;  %v1026_v58 = vld [vmem:[#allocation7 + $0xe0] sm:$0xff]  ;;  %v4002_v60 = vsel %vm989_vm4, %v988_v56, 0.0  ;;  %v494_v62 = vsel %vm480_vm0, %v465_v41, %v466_v48  ;;  %v4016_v1 = vsel %vm1287_vm5, %v1271_v52, %v1272_v57 }
  0x8e   : > { %615 = vmatpush1.msra.mxu0 %v523_v29  ;;  %824 = vmatpush1.msra.mxu1 %v441_v31  ;;  %v1341_v59 = vld [vmem:[#allocation7 + $0x1e0] sm:$0xff]  ;;  %v467_v63 = vrot.slane %v3989_v53, 6  ;;  %v4024_v4 = vsel %vm972_vm3, %v956_v45, %v957_v61  ;;  %v959_v5 = vrot.slane %v3989_v53, 7  ;;  %v4028_v6 = vld [vmem:[%s3925_s16 + $0x28] sm:$0xff]  ;;  %v1025_v7 = vld [vmem:[#allocation7 + $0xd8] sm:$0xff]  ;;  %v4032_v9 = vsel %vm972_vm3, %v957_v61, %v958_v2 }
  0x8f   : > { %616 = vmatprep.subr.mxu0 %v522_v35  ;;  %825 = vmatprep.subr.mxu1 %v440_v36  ;;  %v4020_v3 = vld [vmem:[%s3925_s16 + $0x20] sm:$0xff]  ;;  %v1340_v8 = vld [vmem:[#allocation7 + $0x1d8] sm:$0xff]  ;;  %v4038_v10 = vld [vmem:[%s3925_s16 + $0x30] sm:$0xff]  ;;  %v961_v19 = vrot.slane %v4028_v6, 7  ;;  %v469_v40 = vrot.slane %v4028_v6, 6 }
  0x90   : > { %617 = vmatpush1.msra.mxu0 %v521_v38  ;;  %826 = vmatpush1.msra.mxu1 %v439_v39  ;;  %v1024_v11 = vld [vmem:[#allocation7 + $0xd0] sm:$0xff]  ;;  %v4042_v14 = vsel %vm972_vm3, %v958_v2, %v959_v5  ;;  %v960_v15 = vrot.slane %v4020_v3, 7  ;;  %v493_v16 = vsel %vm480_vm0, %v466_v48, %v467_v63  ;;  %v468_v17 = vrot.slane %v4020_v3, 6  ;;  %v4051_v18 = vld [vmem:[%s3925_s16 + $0x38] sm:$0xff]  ;;  %v4056_v21 = vld [vmem:[%s3925_s16 + $0x40] sm:$0xff] }
  0x91   : > { %2984 = vmatmul.mubr.msk.f32.vlgmr.msra.gmra.mxu0 %vm537_vm2, %v505_v42  ;;  %3000 = vmatmul.mubr.msk.f32.vlgmr.msra.gmra.mxu1 %vm537_vm2, %v3953_v30  ;;  %v1339_v12 = vld [vmem:[#allocation7 + $0x1d0] sm:$0xff]  ;;  %v962_v20 = vrot.slane %v4038_v10, 7  ;;  %v963_v24 = vrot.slane %v4051_v18, 7  ;;  %v4064_v25 = vld [vmem:[%s3925_s16 + $0x48] sm:$0xff]  ;;  %v1022_v33 = vld [vmem:[#allocation7 + $0xc0] sm:$0xff]  ;;  %v964_v38 = vrot.slane %v4056_v21, 7 }
  0x92   : > { %656 = vmatprep.mubr.f32.mxu0 %v3690_v0  ;;  %865 = vmatprep.mubr.f32.mxu1 %v3690_v0  ;;  %v4060_v23 = vsel %vm972_vm3, %v959_v5, %v960_v15  ;;  %v1023_v26 = vld [vmem:[#allocation7 + $0xc8] sm:$0xff]  ;;  %v4068_v28 = vsel %vm972_vm3, %v960_v15, %v961_v19  ;;  %v4078_v31 = vld [vmem:[%s3925_s16 + $0x50] sm:$0xff]  ;;  %v1337_v35 = vld [vmem:[#allocation7 + $0x1c0] sm:$0xff]  ;;  %v492_v39 = vsel %vm480_vm0, %v467_v63, %v468_v17  ;;  %v965_v41 = vrot.slane %v4064_v25, 7 }
  0x93   : > { %1094 = vmatprep.subr.mxu0 %v1029_v44  ;;  %1409 = vmatprep.subr.mxu1 %v1344_v49  ;;  %v1338_v27 = vld [vmem:[#allocation7 + $0x1c8] sm:$0xff]  ;;  %v4072_v29 = vsel %vm972_vm3, %v961_v19, %v962_v20  ;;  %v4082_v36 = vsel %vm972_vm3, %v962_v20, %v963_v24  ;;  %v966_v42 = vrot.slane %v4078_v31, 7  ;;  %v470_v44 = vrot.slane %v4038_v10, 6  ;;  %v4094_v45 = vld [vmem:[%s3925_s16 + $0x58] sm:$0xff]  ;;  %v1020_v61 = vld [vmem:[#allocation7 + $0xb0] sm:$0xff] }
  0x94   : > { %1095 = vmatpush1.msra.mxu0 %v1028_v46  ;;  %1410 = vmatpush1.msra.mxu1 %v1343_v50  ;;  %v4097_v46 = vld [vmem:[%s3925_s16 + $0x60] sm:$0xff]  ;;  %v980_v48 = vsel %vm972_vm3, %v963_v24, %v964_v38  ;;  %v4105_v49 = vld [vmem:[%s3925_s16 + $0x68] sm:$0xff]  ;;  %v1021_v50 = vld [vmem:[#allocation7 + $0xb8] sm:$0xff]  ;;  %v4113_v56 = vsel %vm972_vm3, %v964_v38, %v965_v41  ;;  %v967_v63 = vrot.slane %v4094_v45, 7  ;;  %v491_v5 = vsel %vm480_vm0, %v468_v17, %v469_v40 }
  0x95   : > { %2985 = vmatmul.mubr.msk.f32.gmra.mxu0 %vm537_vm2, %v495_v47  ;;  %3001 = vmatmul.mubr.msk.f32.gmra.mxu1 %vm537_vm2, %v3961_v34  ;;  %v4100_v47 = vadd.s32 56, %v3950_v22  ;;  %v968_v2 = vrot.slane %v4097_v46, 7  ;;  %v1019_v17 = vld [vmem:[#allocation7 + $0xa8] sm:$0xff]  ;;  %v1286_v24 = vrot.slane %v3956_v32, 1 }
  0x96   : > { %662 = vmatprep.mubr.f32.mxu0 %v3690_v0  ;;  %871 = vmatprep.mubr.f32.mxu1 %v3690_v0  ;;  %v1334_v19 = vld [vmem:[#allocation7 + $0x1a8] sm:$0xff] }
  0x97   : > { %1096 = vmatprep.subr.mxu0 %v1027_v54  ;;  %1411 = vmatprep.subr.mxu1 %v1342_v55  ;;  %v1336_v54 = vld [vmem:[#allocation7 + $0x1b8] sm:$0xff]  ;;  %v4109_v55 = vsel %vm989_vm4, %v980_v48, 0.0  ;;  %vm1311_vm6 = vcmp.lt.s32.totalorder %v4100_v47, 63  ;;  %v4144_v15 = vsel %vm972_vm3, %v967_v63, %v968_v2  ;;  %vm1626_vm8 = vcmp.lt.s32.totalorder %v4100_v47, 62 }
  0x98   : > { %1097 = vmatpush1.msra.mxu0 %v1026_v58  ;;  %1412 = vmatpush1.msra.mxu1 %v1341_v59  ;;  %v4117_v58 = vsel %vm972_vm3, %v965_v41, %v966_v42  ;;  %v4123_v59 = vld [vmem:[%s3925_s16 + $0x70] sm:$0xff]  ;;  %v1303_v41 = vsel %vm1287_vm5, %v1286_v24, %v1271_v52  ;;  %v1590_v52 = vrot.slane %v4020_v3, 2  ;;  %v1281_v47 = vrot.slane %v4078_v31, 1  ;;  %s5280_s16 = scalar_lea.hbm %s5335_s7, %s3094_s26 }
  0x99   : > { %2986 = vmatmul.mubr.msk.f32.gmra.mxu0 %vm537_vm2, %v494_v62  ;;  %3002 = vmatmul.mubr.msk.f32.gmra.mxu1 %vm537_vm2, %v3973_v43  ;;  %v1335_v62 = vld [vmem:[#allocation7 + $0x1b0] sm:$0xff]  ;;  %v4181_v48 = vsel %vm1311_vm6, %v1303_v41, 0.0 }
  0x9a   : > { %668 = vmatprep.mubr.f32.mxu0 %v3690_v0  ;;  %877 = vmatprep.mubr.f32.mxu1 %v3690_v0 }
  0x9b   : > { %1098 = vmatprep.subr.mxu0 %v1025_v7  ;;  %1413 = vmatprep.subr.mxu1 %v1340_v8  ;;  %v969_v7 = vrot.slane %v4105_v49, 7  ;;  %v970_v8 = vrot.slane %v4123_v59, 7 }
  0x9c   : > { %1099 = vmatpush1.msra.mxu0 %v1024_v11  ;;  %1414 = vmatpush1.msra.mxu1 %v1339_v12  ;;  %v490_v11 = vsel %vm480_vm0, %v469_v40, %v470_v44  ;;  %v4140_v12 = vsel %vm972_vm3, %v966_v42, %v967_v63  ;;  %v1587_v40 = vrot.slane %v3961_v34, 2  ;;  %v1588_v42 = vrot.slane %v3973_v43, 2 }
  0x9d   : > { %2987 = vmatmul.mubr.msk.f32.gmra.mxu0 %vm537_vm2, %v493_v16  ;;  %3003 = vmatmul.mubr.msk.f32.gmra.mxu1 %vm537_vm2, %v3989_v53  ;;  %v471_v16 = vrot.slane %v4051_v18, 6  ;;  %v4149_v20 = vsel %vm972_vm3, %v968_v2, %v969_v7  ;;  %v4159_v38 = vsel %vm972_vm3, %v969_v7, %v970_v8  ;;  %v1593_v7 = vrot.slane %v4051_v18, 2 }
  0x9e   : > { %674 = vmatprep.mubr.f32.mxu0 %v3690_v0  ;;  %883 = vmatprep.mubr.f32.mxu1 %v3690_v0  ;;  %v4193_v63 = vsel %vm1602_vm7, %v1587_v40, %v1588_v42 }
  0x9f   : > { %1100 = vmatprep.subr.mxu0 %v1023_v26  ;;  %1415 = vmatprep.subr.mxu1 %v1338_v27  ;;  %v1586_v26 = vrot.slane %v3953_v30, 2  ;;  %v472_v27 = vrot.slane %v4056_v21, 6  ;;  %v1657_v30 = vld [vmem:[#allocation7 + $0x268] sm:$0xff] }
  0xa0   : > { %1101 = vmatpush1.msra.mxu0 %v1022_v33  ;;  %1416 = vmatpush1.msra.mxu1 %v1337_v35  ;;  %v1018_v33 = vld [vmem:[#allocation7 + $0xa0] sm:$0xff] }
  0xa1   : > { %2988 = vmatmul.mubr.msk.f32.gmra.mxu0 %vm537_vm2, %v492_v39  ;;  %3004 = vmatmul.mubr.msk.f32.gmra.mxu1 %vm537_vm2, %v4020_v3  ;;  %v1333_v35 = vld [vmem:[#allocation7 + $0x1a0] sm:$0xff]  ;;  %v4165_v39 = vsel %vm972_vm3, %v970_v8, %v971_v51  ;;  %v1589_v51 = vrot.slane %v3989_v53, 2  ;;  %v1016_v8 = vld [vmem:[#allocation7 + $0x90] sm:$0xff] }
  0xa2   : > { %680 = vmatprep.mubr.f32.mxu0 %v3690_v0  ;;  %889 = vmatprep.mubr.f32.mxu1 %v3690_v0 }
  0xa3   : > { %1102 = vmatprep.subr.mxu0 %v1021_v50  ;;  %1417 = vmatprep.subr.mxu1 %v1336_v54  ;;  %v4187_v50 = vsel %vm1602_vm7, %v1586_v26, %v1587_v40  ;;  %v1591_v54 = vrot.slane %v4028_v6, 2  ;;  %v4197_v2 = vsel %vm1602_vm7, %v1588_v42, %v1589_v51  ;;  %v488_v42 = vsel %vm480_vm0, %v471_v16, %v472_v27 }
  0xa4   : > { %1103 = vmatpush1.msra.mxu0 %v1020_v61  ;;  %1418 = vmatpush1.msra.mxu1 %v1335_v62  ;;  %v1017_v61 = vld [vmem:[#allocation7 + $0x98] sm:$0xff] }
  0xa5   : > { %2989 = vmatmul.mubr.msk.f32.gmra.mxu0 %vm537_vm2, %v491_v5  ;;  %3005 = vmatmul.mubr.msk.f32.gmra.mxu1 %vm537_vm2, %v4028_v6  ;;  %v1332_v62 = vld [vmem:[#allocation7 + $0x198] sm:$0xff]  ;;  %v1592_v5 = vrot.slane %v4038_v10, 2 }
  0xa6   : > { %686 = vmatprep.mubr.f32.mxu0 %v3690_v0  ;;  %895 = vmatprep.mubr.f32.mxu1 %v3690_v0 }
  0xa7   : > { %1104 = vmatprep.subr.mxu0 %v1019_v17  ;;  %1419 = vmatprep.subr.mxu1 %v1334_v19  ;;  %v1331_v17 = vld [vmem:[#allocation7 + $0x190] sm:$0xff]  ;;  %v4206_v19 = vsel %vm1602_vm7, %v1589_v51, %v1590_v52  ;;  %v4221_v40 = vsel %vm1602_vm7, %v1591_v54, %v1592_v5  ;;  %v4225_v41 = vsel %vm1602_vm7, %v1592_v5, %v1593_v7  ;;  %v1015_v51 = vld [vmem:[#allocation7 + $0x88] sm:$0xff]  ;;  %v1014_v5 = vld [vmem:[#allocation7 + $0x80] sm:$0xff] }
  0xa8   : > { %1105 = vmatpush1.msra.mxu0 %v1018_v33  ;;  %1420 = vmatpush1.msra.mxu1 %v1333_v35  ;;  %v4210_v33 = vsel %vm1602_vm7, %v1590_v52, %v1591_v54  ;;  %v1594_v35 = vrot.slane %v4056_v21, 2  ;;  %v1330_v52 = vld [vmem:[#allocation7 + $0x188] sm:$0xff] }
  0xa9   : > { %2990 = vmatmul.mubr.msk.f32.gmra.mxu0 %vm537_vm2, %v490_v11  ;;  %3006 = vmatmul.mubr.msk.f32.gmra.mxu1 %vm537_vm2, %v4038_v10  ;;  %v489_v11 = vsel %vm480_vm0, %v470_v44, %v471_v16  ;;  %v1329_v16 = vld [vmem:[#allocation7 + $0x180] sm:$0xff] }
  0xaa   : > { %692 = vmatprep.mubr.f32.mxu0 %v3690_v0  ;;  %901 = vmatprep.mubr.f32.mxu1 %v3690_v0  ;;  %v1610_v44 = vsel %vm1602_vm7, %v1593_v7, %v1594_v35  ;;  %v1595_v7 = vrot.slane %v4064_v25, 2 }
  0xab   : > { %1106 = vmatprep.subr.mxu0 %v1017_v61  ;;  %1421 = vmatprep.subr.mxu1 %v1332_v62  ;;  %v4236_v54 = vsel %vm1626_vm8, %v1610_v44, 0.0  ;;  %v513_v61 = vsel %vm497_vm1, %v488_v42, 0.0  ;;  %v473_v62 = vrot.slane %v4064_v25, 6  ;;  %v474_v42 = vrot.slane %v4078_v31, 6 }
  0xac   : > { %1107 = vmatpush1.msra.mxu0 %v1016_v8  ;;  %1422 = vmatpush1.msra.mxu1 %v1331_v17  ;;  %v1659_v8 = vld [vmem:[#allocation7 + $0x278] sm:$0xff]  ;;  %v4249_v17 = vsel %vm1602_vm7, %v1594_v35, %v1595_v7  ;;  %v1596_v44 = vrot.slane %v4078_v31, 2 }
  0xad   : > { %2991 = vmatmul.mubr.msk.f32.gmra.mxu0 %vm537_vm2, %v489_v11  ;;  %3007 = vmatmul.mubr.msk.f32.gmra.mxu1 %vm537_vm2, %v4051_v18  ;;  %v487_v11 = vsel %vm480_vm0, %v472_v27, %v473_v62  ;;  %v486_v27 = vsel %vm480_vm0, %v473_v62, %v474_v42  ;;  %v1598_v62 = vrot.slane %v4097_v46, 2 }
  0xae   : > { %698 = vmatprep.mubr.f32.mxu0 %v3690_v0  ;;  %907 = vmatprep.mubr.f32.mxu1 %v3690_v0  ;;  %v4264_v35 = vsel %vm1602_vm7, %v1595_v7, %v1596_v44 }
  0xaf   : > { %1108 = vmatprep.subr.mxu0 %v1015_v51  ;;  %1423 = vmatprep.subr.mxu1 %v1330_v52  ;;  %v475_v51 = vrot.slane %v4094_v45, 6  ;;  %v1597_v52 = vrot.slane %v4094_v45, 2 }
  0xb0   : > { %1109 = vmatpush1.msra.mxu0 %v1014_v5  ;;  %1424 = vmatpush1.msra.mxu1 %v1329_v16 }
  0xb1   : > { %2992 = vmatmul.mubr.msk.f32.gmra.mxu0 %vm537_vm2, %v513_v61  ;;  %3008 = vmatmul.mubr.msk.f32.gmra.mxu1 %vm537_vm2, %v4056_v21  ;;  %v4277_v5 = vsel %vm1602_vm7, %v1596_v44, %v1597_v52  ;;  %v485_v16 = vsel %vm480_vm0, %v474_v42, %v475_v51  ;;  %v476_v61 = vrot.slane %v4097_v46, 6  ;;  %v4290_v7 = vsel %vm1602_vm7, %v1597_v52, %v1598_v62 }
  0xb2   : > { %704 = vmatprep.mubr.f32.mxu0 %v3690_v0  ;;  %913 = vmatprep.mubr.f32.mxu1 %v3690_v0  ;;  %v1599_v42 = vrot.slane %v4105_v49, 2  ;;  %v1600_v52 = vrot.slane %v4123_v59, 2 }
  0xb3   : > { %1724 = vmatprep.subr.mxu0 %v1659_v8  ;;  %v484_v8 = vsel %vm480_vm0, %v475_v51, %v476_v61  ;;  %v478_v51 = vrot.slane %v4123_v59, 6 }
  0xb4   : > { %v4303_v44 = vsel %vm1602_vm7, %v1598_v62, %v1599_v42  ;;  %v1601_v62 = vrot.slane %v3956_v32, 2 }
  0xb5   : > { %2993 = vmatmul.mubr.msk.f32.gmra.mxu0 %vm537_vm2, %v487_v11  ;;  %3009 = vmatmul.mubr.msk.f32.gmra.mxu1 %vm537_vm2, %v4064_v25  ;;  %v477_v11 = vrot.slane %v4105_v49, 6 }
  0xb6   : > { %710 = vmatprep.mubr.f32.mxu0 %v3690_v0  ;;  %919 = vmatprep.mubr.f32.mxu1 %v3690_v0 }
  0xb9   : > { %2994 = vmatmul.mubr.msk.f32.gmra.mxu0 %vm537_vm2, %v486_v27  ;;  %3010 = vmatmul.mubr.msk.f32.gmra.mxu1 %vm537_vm2, %v4078_v31  ;;  %v483_v27 = vsel %vm480_vm0, %v476_v61, %v477_v11  ;;  %v482_v61 = vsel %vm480_vm0, %v477_v11, %v478_v51  ;;  %v481_v11 = vsel %vm480_vm0, %v478_v51, %v479_v37  ;;  %v1273_v37 = vrot.slane %v3973_v43, 1  ;;  %v1658_v51 = vld [vmem:[#allocation7 + $0x270] sm:$0xff]  ;;  %v1656_v43 = vld [vmem:[#allocation7 + $0x260] sm:$0xff] }
  0xba   : > { %716 = vmatprep.mubr.f32.mxu0 %v3690_v0  ;;  %925 = vmatprep.mubr.f32.mxu1 %v3690_v0 }
  0xbd   : > { %2995 = vmatmul.mubr.msk.f32.gmra.mxu0 %vm537_vm2, %v485_v16  ;;  %3011 = vmatmul.mubr.msk.f32.gmra.mxu1 %vm537_vm2, %v4094_v45  ;;  %v4316_v16 = vsel %vm1602_vm7, %v1599_v42, %v1600_v52  ;;  %v1618_v42 = vsel %vm1602_vm7, %v1601_v62, %v1586_v26  ;;  %v1301_v26 = vsel %vm1287_vm5, %v1272_v57, %v1273_v37  ;;  %v1275_v57 = vrot.slane %v4020_v3, 1  ;;  %v1652_v3 = vld [vmem:[#allocation7 + $0x240] sm:$0xff] }
  0xbe   : > { %722 = vmatprep.mubr.f32.mxu0 %v3690_v0  ;;  %931 = vmatprep.mubr.f32.mxu1 %v3690_v0 }
  0xc1   : > { %2996 = vmatmul.mubr.msk.f32.gmra.mxu0 %vm537_vm2, %v484_v8  ;;  %3012 = vmatmul.mubr.msk.f32.gmra.mxu1 %vm537_vm2, %v4097_v46  ;;  %v4328_v8 = vsel %vm1602_vm7, %v1600_v52, %v1601_v62  ;;  %v1274_v52 = vrot.slane %v3989_v53, 1  ;;  %v1654_v53 = vld [vmem:[#allocation7 + $0x250] sm:$0xff] }
  0xc2   : > { %728 = vmatprep.mubr.f32.mxu0 %v3690_v0  ;;  %937 = vmatprep.mubr.f32.mxu1 %v3690_v0 }
  0xc3   : > { %v1300_v34 = vsel %vm1287_vm5, %v1273_v37, %v1274_v52  ;;  %v1278_v37 = vrot.slane %v4051_v18, 1 }
  0xc5   : > { %2997 = vmatmul.mubr.msk.f32.gmra.mxu0 %vm537_vm2, %v483_v27  ;;  %3013 = vmatmul.mubr.msk.f32.gmra.mxu1 %vm537_vm2, %v4105_v49  ;;  %v4345_v27 = vsel %vm1626_vm8, %v1618_v42, 0.0 }
  0xc6   : > { %734 = vmatprep.mubr.f32.mxu0 %v3690_v0  ;;  %943 = vmatprep.mubr.f32.mxu1 %v3690_v0 }
  0xc9   : > { %2998 = vmatmul.mubr.msk.f32.gmra.mxu0 %vm537_vm2, %v482_v61  ;;  %3014 = vmatmul.mubr.msk.f32.gmra.mxu1 %vm537_vm2, %v4123_v59  ;;  %v1276_v61 = vrot.slane %v4028_v6, 1  ;;  %v1650_v6 = vld [vmem:[#allocation7 + $0x230] sm:$0xff] }
  0xca   : > { %740 = vmatprep.mubr.f32.mxu0 %v3690_v0  ;;  %949 = vmatprep.mubr.f32.mxu1 %v3690_v0 }
  0xcb   : > { %v1298_v62 = vsel %vm1287_vm5, %v1275_v57, %v1276_v61 }
  0xcd   : > { %2999 = vmatmul.mubr.msk.f32.gmra.mxu0 %vm537_vm2, %v481_v11  ;;  %3015 = vmatmul.mubr.msk.f32.gmra.mxu1 %vm537_vm2, %v3956_v32  ;;  %v1277_v11 = vrot.slane %v4038_v10, 1  ;;  %v1279_v10 = vrot.slane %v4056_v21, 1  ;;  %v1646_v21 = vld [vmem:[#allocation7 + $0x210] sm:$0xff]  ;;  %v1976_v32 = vld [vmem:[#allocation8 + $0xf8] sm:$0xff] }
  0xce   : > { %1142 = vmatprep.mubr.f32.mxu0 %v3690_v0  ;;  %1457 = vmatprep.mubr.f32.mxu1 %v3690_v0 }
  0xcf   : > { %v1297_v42 = vsel %vm1287_vm5, %v1276_v61, %v1277_v11  ;;  %v1295_v18 = vsel %vm1287_vm5, %v1278_v37, %v1279_v10  ;;  %3095 = vmatprep.subr.mxu1 %v1976_v32  ;;  %v1966_v61 = vld [vmem:[#allocation8 + $0xa8] sm:$0xff] }
  0xd1   : > { %3016 = vmatmul.mubr.msk.f32.vlgmr.msra.gmra.mxu0 %vm537_vm2, %v4002_v60  ;;  %3032 = vmatmul.mubr.msk.f32.vlgmr.msra.gmra.mxu1 %vm537_vm2, %v4016_v1  ;;  %v1655_v60 = vld [vmem:[#allocation7 + $0x258] sm:$0xff]  ;;  %v1653_v1 = vld [vmem:[#allocation7 + $0x248] sm:$0xff] }
  0xd2   : > { %1148 = vmatprep.mubr.f32.mxu0 %v3690_v0  ;;  %1463 = vmatprep.mubr.f32.mxu1 %v3690_v0 }
  0xd3   : > { %1725 = vmatpush1.msra.mxu0 %v1658_v51  ;;  %v1648_v51 = vld [vmem:[#allocation7 + $0x220] sm:$0xff] }
  0xd4   : > { %1726 = vmatprep.subr.mxu0 %v1657_v30  ;;  %v1296_v30 = vsel %vm1287_vm5, %v1277_v11, %v1278_v37  ;;  %v1948_v11 = vld [vmem:[#allocation8 + $0x18] sm:$0xff]  ;;  %v1945_v37 = vld [vmem:[#allocation8] sm:$0xff] }
  0xd5   : > { %3017 = vmatmul.mubr.msk.f32.gmra.mxu0 %vm537_vm2, %v4024_v4  ;;  %3033 = vmatmul.mubr.msk.f32.gmra.mxu1 %vm537_vm2, %v1301_v26  ;;  %v1299_v4 = vsel %vm1287_vm5, %v1274_v52, %v1275_v57  ;;  %v1319_v26 = vsel %vm1311_vm6, %v1295_v18, 0.0  ;;  %v1280_v52 = vrot.slane %v4064_v25, 1  ;;  %v1969_v57 = vld [vmem:[#allocation8 + $0xc0] sm:$0xff] }
  0xd6   : > { %1154 = vmatprep.mubr.f32.mxu0 %v3690_v0  ;;  %1469 = vmatprep.mubr.f32.mxu1 %v3690_v0  ;;  %v410_v18 = vld [vmem:[%s3933_s21 + $0x20] sm:$0xff] }
  0xd7   : > { %1727 = vmatpush1.msra.mxu0 %v1656_v43  ;;  %v1644_v43 = vld [vmem:[#allocation7 + $0x200] sm:$0xff]  ;;  %v1293_v25 = vsel %vm1287_vm5, %v1280_v52, %v1281_v47 }
  0xd8   : > { %1728 = vmatprep.subr.mxu0 %v1655_v60  ;;  %v1970_v60 = vld [vmem:[#allocation8 + $0xc8] sm:$0xff] }
  0xd9   : > { %3018 = vmatmul.mubr.msk.f32.gmra.mxu0 %vm537_vm2, %v4032_v9  ;;  %3034 = vmatmul.mubr.msk.f32.gmra.mxu1 %vm537_vm2, %v1300_v34  ;;  %v1651_v9 = vld [vmem:[#allocation7 + $0x238] sm:$0xff]  ;;  %v1954_v34 = vld [vmem:[#allocation8 + $0x48] sm:$0xff] }
  0xda   : > { %1160 = vmatprep.mubr.f32.mxu0 %v3690_v0  ;;  %1475 = vmatprep.mubr.f32.mxu1 %v3690_v0 }
  0xdb   : > { %1729 = vmatpush1.msra.mxu0 %v1654_v53  ;;  %v1968_v53 = vld [vmem:[#allocation8 + $0xb8] sm:$0xff] }
  0xdc   : > { %1730 = vmatprep.subr.mxu0 %v1653_v1  ;;  %v1952_v1 = vld [vmem:[#allocation8 + $0x38] sm:$0xff] }
  0xdd   : > { %3019 = vmatmul.mubr.msk.f32.gmra.mxu0 %vm537_vm2, %v4042_v14  ;;  %3035 = vmatmul.mubr.msk.f32.gmra.mxu1 %vm537_vm2, %v1299_v4  ;;  %v1649_v14 = vld [vmem:[#allocation7 + $0x228] sm:$0xff]  ;;  %v1967_v4 = vld [vmem:[#allocation8 + $0xb0] sm:$0xff] }
  0xde   : > { %1166 = vmatprep.mubr.f32.mxu0 %v3690_v0  ;;  %1481 = vmatprep.mubr.f32.mxu1 %v3690_v0 }
  0xdf   : > { %1731 = vmatpush1.msra.mxu0 %v1652_v3  ;;  %v1950_v3 = vld [vmem:[#allocation8 + $0x28] sm:$0xff] }
  0xe0   : > { %1732 = vmatprep.subr.mxu0 %v1651_v9  ;;  %v1965_v9 = vld [vmem:[#allocation8 + $0xa0] sm:$0xff] }
  0xe1   : > { %3020 = vmatmul.mubr.msk.f32.gmra.mxu0 %vm537_vm2, %v4060_v23  ;;  %3036 = vmatmul.mubr.msk.f32.gmra.mxu1 %vm537_vm2, %v1298_v62  ;;  %v1647_v23 = vld [vmem:[#allocation7 + $0x218] sm:$0xff] }
  0xe2   : > { %1172 = vmatprep.mubr.f32.mxu0 %v3690_v0  ;;  %1487 = vmatprep.mubr.f32.mxu1 %v3690_v0  ;;  %v1964_v62 = vld [vmem:[#allocation8 + $0x98] sm:$0xff] }
  0xe3   : > { %1733 = vmatpush1.msra.mxu0 %v1650_v6  ;;  %v1947_v6 = vld [vmem:[#allocation8 + $0x10] sm:$0xff] }
  0xe4   : > { %1734 = vmatprep.subr.mxu0 %v1649_v14  ;;  %v1962_v14 = vld [vmem:[#allocation8 + $0x88] sm:$0xff] }
  0xe5   : > { %3021 = vmatmul.mubr.msk.f32.gmra.mxu0 %vm537_vm2, %v4068_v28  ;;  %3037 = vmatmul.mubr.msk.f32.gmra.mxu1 %vm537_vm2, %v1297_v42  ;;  %v1645_v28 = vld [vmem:[#allocation7 + $0x208] sm:$0xff] }
  0xe6   : > { %1178 = vmatprep.mubr.f32.mxu0 %v3690_v0  ;;  %1493 = vmatprep.mubr.f32.mxu1 %v3690_v0  ;;  %v1946_v42 = vld [vmem:[#allocation8 + $0x8] sm:$0xff] }
  0xe7   : > { %1735 = vmatpush1.msra.mxu0 %v1648_v51  ;;  %v406_v51 = vld [vmem:[%s3933_s21] sm:$0xff] }
  0xe8   : > { %1736 = vmatprep.subr.mxu0 %v1647_v23  ;;  %v408_v23 = vld [vmem:[%s3933_s21 + $0x10] sm:$0xff] }
  0xe9   : > { %3022 = vmatmul.mubr.msk.f32.gmra.mxu0 %vm537_vm2, %v4072_v29  ;;  %3038 = vmatmul.mubr.msk.f32.gmra.mxu1 %vm537_vm2, %v1296_v30  ;;  %v1294_v29 = vsel %vm1287_vm5, %v1279_v10, %v1280_v52  ;;  %v407_v10 = vld [vmem:[%s3933_s21 + $0x8] sm:$0xff]  ;;  %v418_v52 = vld [vmem:[%s3933_s21 + $0x60] sm:$0xff] }
  0xea   : > { %1184 = vmatprep.mubr.f32.mxu0 %v3690_v0  ;;  %1499 = vmatprep.mubr.f32.mxu1 %v3690_v0  ;;  %v411_v30 = vld [vmem:[%s3933_s21 + $0x28] sm:$0xff] }
  0xeb   : > { %1737 = vmatpush1.msra.mxu0 %v1646_v21  ;;  %v412_v21 = vld [vmem:[%s3933_s21 + $0x30] sm:$0xff] }
  0xec   : > { %1738 = vmatprep.subr.mxu0 %v1645_v28  ;;  %v414_v28 = vld [vmem:[%s3933_s21 + $0x40] sm:$0xff] }
  0xed   : > { %3023 = vmatmul.mubr.msk.f32.gmra.mxu0 %vm537_vm2, %v4082_v36  ;;  %3039 = vmatmul.mubr.msk.f32.gmra.mxu1 %vm537_vm2, %v1319_v26  ;;  %v1282_v36 = vrot.slane %v4094_v45, 1  ;;  %v416_v26 = vld [vmem:[%s3933_s21 + $0x50] sm:$0xff] }
  0xee   : > { %1190 = vmatprep.mubr.f32.mxu0 %v3690_v0  ;;  %1505 = vmatprep.mubr.f32.mxu1 %v3690_v0 }
  0xef   : > { %1739 = vmatpush1.msra.mxu0 %v1644_v43  ;;  %v1292_v31 = vsel %vm1287_vm5, %v1281_v47, %v1282_v36 }
  0xf1   : > { %3024 = vmatmul.mubr.msk.f32.gmra.mxu0 %vm537_vm2, %v4109_v55  ;;  %3040 = vmatmul.mubr.msk.f32.gmra.mxu1 %vm537_vm2, %v1294_v29  ;;  %v1283_v55 = vrot.slane %v4097_v46, 1 }
  0xf2   : > { %1196 = vmatprep.mubr.f32.mxu0 %v3690_v0  ;;  %1511 = vmatprep.mubr.f32.mxu1 %v3690_v0 }
  0xf3   : > { %v1291_v45 = vsel %vm1287_vm5, %v1282_v36, %v1283_v55 }
  0xf5   : > { %3025 = vmatmul.mubr.msk.f32.gmra.mxu0 %vm537_vm2, %v4113_v56  ;;  %3041 = vmatmul.mubr.msk.f32.gmra.mxu1 %vm537_vm2, %v1293_v25  ;;  %v1284_v56 = vrot.slane %v4105_v49, 1  ;;  %v421_v25 = vld [vmem:[%s3933_s21 + $0x78] sm:$0xff] }
  0xf6   : > { %1202 = vmatprep.mubr.f32.mxu0 %v3690_v0  ;;  %1517 = vmatprep.mubr.f32.mxu1 %v3690_v0 }
  0xf7   : > { %v1290_v46 = vsel %vm1287_vm5, %v1283_v55, %v1284_v56 }
  0xf9   : > { %3026 = vmatmul.mubr.msk.f32.gmra.mxu0 %vm537_vm2, %v4117_v58  ;;  %3042 = vmatmul.mubr.msk.f32.gmra.mxu1 %vm537_vm2, %v1292_v31  ;;  %v1285_v58 = vrot.slane %v4123_v59, 1  ;;  %v420_v31 = vld [vmem:[%s3933_s21 + $0x70] sm:$0xff] }
  0xfa   : > { %1208 = vmatprep.mubr.f32.mxu0 %v3690_v0  ;;  %1523 = vmatprep.mubr.f32.mxu1 %v3690_v0 }
  0xfb   : > { %v1289_v49 = vsel %vm1287_vm5, %v1284_v56, %v1285_v58  ;;  %v1288_v59 = vsel %vm1287_vm5, %v1285_v58, %v1286_v24  ;;  %v1974_v24 = vld [vmem:[#allocation8 + $0xe8] sm:$0xff] }
  0xfc   : > { %v423_v58 = vld [vmem:[%s3933_s21 + $0x88] sm:$0xff] }
  0xfd   : > { %3027 = vmatmul.mubr.msk.f32.gmra.mxu0 %vm537_vm2, %v4140_v12  ;;  %3043 = vmatmul.mubr.msk.f32.gmra.mxu1 %vm537_vm2, %v1291_v45  ;;  %v1960_v12 = vld [vmem:[#allocation8 + $0x78] sm:$0xff] }
  0xfe   : > { %1214 = vmatprep.mubr.f32.mxu0 %v3690_v0  ;;  %1529 = vmatprep.mubr.f32.mxu1 %v3690_v0 }
  0xff   : > { %3096 = vmatpush3.msra.mxu1 %v1960_v12 }
 0x101   : > { %3028 = vmatmul.mubr.msk.f32.gmra.mxu0 %vm537_vm2, %v4144_v15  ;;  %3044 = vmatmul.mubr.msk.f32.gmra.mxu1 %vm537_vm2, %v1290_v46  ;;  %v1975_v15 = vld [vmem:[#allocation8 + $0xf0] sm:$0xff] }
 0x102   : > { %1220 = vmatprep.mubr.f32.mxu0 %v3690_v0  ;;  %1535 = vmatprep.mubr.f32.mxu1 %v3690_v0 }
 0x103   : > { %3097 = vmatprep.subr.mxu1 %v1975_v15 }
 0x105   : > { %3029 = vmatmul.mubr.msk.f32.gmra.mxu0 %vm537_vm2, %v4149_v20  ;;  %3045 = vmatmul.mubr.msk.f32.gmra.mxu1 %vm537_vm2, %v1289_v49  ;;  %v1959_v20 = vld [vmem:[#allocation8 + $0x70] sm:$0xff] }
 0x106   : > { %1226 = vmatprep.mubr.f32.mxu0 %v3690_v0  ;;  %1541 = vmatprep.mubr.f32.mxu1 %v3690_v0 }
 0x107   : > { %3098 = vmatpush3.msra.mxu1 %v1959_v20 }
 0x108   : > { %3099 = vmatprep.subr.mxu1 %v1974_v24 }
 0x109   : > { %3030 = vmatmul.mubr.msk.f32.gmra.mxu0 %vm537_vm2, %v4159_v38  ;;  %3046 = vmatmul.mubr.msk.f32.gmra.mxu1 %vm537_vm2, %v1288_v59  ;;  %v1958_v38 = vld [vmem:[#allocation8 + $0x68] sm:$0xff]  ;;  %v422_v59 = vld [vmem:[%s3933_s21 + $0x80] sm:$0xff] }
 0x10a   : > { %1232 = vmatprep.mubr.f32.mxu0 %v3690_v0  ;;  %1547 = vmatprep.mubr.f32.mxu1 %v3690_v0 }
 0x10b   : > { %3100 = vmatpush3.msra.mxu1 %v1958_v38  ;;  %v425_v38 = vld [vmem:[%s3933_s21 + $0x98] sm:$0xff] }
 0x10d   : > { %3031 = vmatmul.mubr.msk.f32.gmra.mxu0 %vm537_vm2, %v4165_v39  ;;  %3047 = vmatmul.mubr.msk.f32.gmra.mxu1 %vm537_vm2, %v4181_v48  ;;  %v1973_v39 = vld [vmem:[#allocation8 + $0xe0] sm:$0xff] }
 0x10e   : > { %1772 = vmatprep.mubr.f32.mxu0 %v3690_v0  ;;  %3101 = vmatprep.subr.mxu1 %v1973_v39  ;;  %v1957_v48 = vld [vmem:[#allocation8 + $0x60] sm:$0xff] }
 0x10f   : > { %3102 = vmatpush3.msra.mxu1 %v1957_v48  ;;  %2048 = vmatprep.mubr.f32.mxu1 %v407_v10  ;;  %v424_v48 = vld [vmem:[%s3933_s21 + $0x90] sm:$0xff] }
 0x111   : > { %3048 = vmatmul.mubr.msk.f32.vlgmr.msra.gmra.mxu0 %vm537_vm2, %v4187_v50  ;;  %v1972_v50 = vld [vmem:[#allocation8 + $0xd8] sm:$0xff] }
 0x112   : > { %1778 = vmatprep.mubr.f32.mxu0 %v3690_v0  ;;  %3103 = vmatprep.subr.mxu1 %v1972_v50 }
 0x115   : > { %3049 = vmatmul.mubr.msk.f32.gmra.mxu0 %vm537_vm2, %v4193_v63  ;;  %v1956_v63 = vld [vmem:[#allocation8 + $0x58] sm:$0xff] }
 0x116   : > { %1784 = vmatprep.mubr.f32.mxu0 %v3690_v0  ;;  %3104 = vmatpush3.msra.mxu1 %v1956_v63 }
 0x119   : > { %3050 = vmatmul.mubr.msk.f32.gmra.mxu0 %vm537_vm2, %v4197_v2  ;;  %v1971_v2 = vld [vmem:[#allocation8 + $0xd0] sm:$0xff] }
 0x11a   : > { %1790 = vmatprep.mubr.f32.mxu0 %v3690_v0  ;;  %3105 = vmatprep.subr.mxu1 %v1971_v2 }
 0x11d   : > { %3051 = vmatmul.mubr.msk.f32.gmra.mxu0 %vm537_vm2, %v4206_v19  ;;  %v1955_v19 = vld [vmem:[#allocation8 + $0x50] sm:$0xff] }
 0x11e   : > { %1796 = vmatprep.mubr.f32.mxu0 %v3690_v0  ;;  %3106 = vmatpush3.msra.mxu1 %v1955_v19 }
 0x11f   : > { %3107 = vmatprep.subr.mxu1 %v1970_v60 }
 0x120   : > { %3108 = vmatpush3.msra.mxu1 %v1954_v34  ;;  %v427_v34 = vld [vmem:[%s3933_s21 + $0xa8] sm:$0xff] }
 0x121   : > { %3052 = vmatmul.mubr.msk.f32.gmra.mxu0 %vm537_vm2, %v4210_v33  ;;  %3109 = vmatprep.subr.mxu1 %v1969_v57  ;;  %v1953_v33 = vld [vmem:[#allocation8 + $0x40] sm:$0xff] }
 0x122   : > { %1802 = vmatprep.mubr.f32.mxu0 %v3690_v0  ;;  %3110 = vmatpush3.msra.mxu1 %v1953_v33  ;;  %v426_v33 = vld [vmem:[%s3933_s21 + $0xa0] sm:$0xff] }
 0x123   : > { %3111 = vmatprep.subr.mxu1 %v1968_v53 }
 0x124   : > { %3112 = vmatpush3.msra.mxu1 %v1952_v1 }
 0x125   : > { %3053 = vmatmul.mubr.msk.f32.gmra.mxu0 %vm537_vm2, %v4221_v40  ;;  %3113 = vmatprep.subr.mxu1 %v1967_v4  ;;  %v1951_v40 = vld [vmem:[#allocation8 + $0x30] sm:$0xff] }
 0x126   : > { %1808 = vmatprep.mubr.f32.mxu0 %v3690_v0  ;;  %3114 = vmatpush3.msra.mxu1 %v1951_v40 }
 0x127   : > { %3115 = vmatprep.subr.mxu1 %v1966_v61 }
 0x128   : > { %3116 = vmatpush3.msra.mxu1 %v1950_v3  ;;  %v429_v3 = vld [vmem:[%s3933_s21 + $0xb8] sm:$0xff] }
 0x129   : > { %3054 = vmatmul.mubr.msk.f32.gmra.mxu0 %vm537_vm2, %v4225_v41  ;;  %3117 = vmatprep.subr.mxu1 %v1965_v9  ;;  %v1949_v41 = vld [vmem:[#allocation8 + $0x20] sm:$0xff] }
 0x12a   : > { %1814 = vmatprep.mubr.f32.mxu0 %v3690_v0  ;;  %3118 = vmatpush3.msra.mxu1 %v1949_v41  ;;  %v428_v41 = vld [vmem:[%s3933_s21 + $0xb0] sm:$0xff] }
 0x12b   : > { %3119 = vmatprep.subr.mxu1 %v1964_v62 }
 0x12c   : > { %3120 = vmatpush3.msra.mxu1 %v1948_v11 }
 0x12d   : > { %3055 = vmatmul.mubr.msk.f32.gmra.mxu0 %vm537_vm2, %v4236_v54  ;;  %v1963_v54 = vld [vmem:[#allocation8 + $0x90] sm:$0xff] }
 0x12e   : > { %1820 = vmatprep.mubr.f32.mxu0 %v3690_v0  ;;  %3121 = vmatprep.subr.mxu1 %v1963_v54 }
 0x12f   : > { %3122 = vmatpush3.msra.mxu1 %v1947_v6 }
 0x130   : > { %3123 = vmatprep.subr.mxu1 %v1962_v14 }
 0x131   : > { %3056 = vmatmul.mubr.msk.f32.gmra.mxu0 %vm537_vm2, %v4249_v17  ;;  %3124 = vmatpush3.msra.mxu1 %v1946_v42  ;;  %v1961_v17 = vld [vmem:[#allocation8 + $0x80] sm:$0xff]  ;;  %v431_v42 = vld [vmem:[%s3933_s21 + $0xc8] sm:$0xff] }
 0x132   : > { %1826 = vmatprep.mubr.f32.mxu0 %v3690_v0  ;;  %3125 = vmatprep.subr.mxu1 %v1961_v17 }
 0x133   : > { %3126 = vmatpush3.msra.mxu1 %v1945_v37  ;;  %v430_v37 = vld [vmem:[%s3933_s21 + $0xc0] sm:$0xff] }
 0x134   : > { %2049 = vmatmul.mubr.f32.vlgmr.msra.gmra.mxu1 %v406_v51 }
 0x135   : > { %3057 = vmatmul.mubr.msk.f32.gmra.mxu0 %vm537_vm2, %v4264_v35  ;;  %v409_v35 = vld [vmem:[%s3933_s21 + $0x18] sm:$0xff] }
 0x136   : > { %1832 = vmatprep.mubr.f32.mxu0 %v3690_v0  ;;  %2053 = vmatprep.mubr.f32.mxu1 %v409_v35 }
 0x138   : > { %2054 = vmatmul.mubr.f32.gmra.mxu1 %v408_v23 }
 0x139   : > { %3058 = vmatmul.mubr.msk.f32.gmra.mxu0 %vm537_vm2, %v4277_v5  ;;  %2058 = vmatprep.mubr.f32.mxu1 %v411_v30  ;;  %v413_v5 = vld [vmem:[%s3933_s21 + $0x38] sm:$0xff] }
 0x13a   : > { %1838 = vmatprep.mubr.f32.mxu0 %v3690_v0 }
 0x13c   : > { %2059 = vmatmul.mubr.f32.gmra.mxu1 %v410_v18  ;;  %v433_v18 = vld [vmem:[%s3933_s21 + $0xd8] sm:$0xff] }
 0x13d   : > { %3059 = vmatmul.mubr.msk.f32.gmra.mxu0 %vm537_vm2, %v4290_v7  ;;  %2063 = vmatprep.mubr.f32.mxu1 %v413_v5  ;;  %v415_v7 = vld [vmem:[%s3933_s21 + $0x48] sm:$0xff] }
 0x13e   : > { %1844 = vmatprep.mubr.f32.mxu0 %v3690_v0 }
 0x140   : > { %2064 = vmatmul.mubr.f32.gmra.mxu1 %v412_v21  ;;  %v432_v21 = vld [vmem:[%s3933_s21 + $0xd0] sm:$0xff] }
 0x141   : > { %3060 = vmatmul.mubr.msk.f32.gmra.mxu0 %vm537_vm2, %v4303_v44  ;;  %2068 = vmatprep.mubr.f32.mxu1 %v415_v7  ;;  %v417_v44 = vld [vmem:[%s3933_s21 + $0x58] sm:$0xff] }
 0x142   : > { %1850 = vmatprep.mubr.f32.mxu0 %v3690_v0 }
 0x144   : > { %2069 = vmatmul.mubr.f32.gmra.mxu1 %v414_v28 }
 0x145   : > { %3061 = vmatmul.mubr.msk.f32.gmra.mxu0 %vm537_vm2, %v4316_v16  ;;  %2073 = vmatprep.mubr.f32.mxu1 %v417_v44  ;;  %v419_v16 = vld [vmem:[%s3933_s21 + $0x68] sm:$0xff] }
 0x146   : > { %1856 = vmatprep.mubr.f32.mxu0 %v3690_v0 }
 0x148   : > { %2074 = vmatmul.mubr.f32.gmra.mxu1 %v416_v26 }
 0x149   : > { %3062 = vmatmul.mubr.msk.f32.gmra.mxu0 %vm537_vm2, %v4328_v8  ;;  %2078 = vmatprep.mubr.f32.mxu1 %v419_v16 }
 0x14a   : > { %1862 = vmatprep.mubr.f32.mxu0 %v3690_v0 }
 0x14c   : > { %2079 = vmatmul.mubr.f32.gmra.mxu1 %v418_v52  ;;  %v435_v52 = vld [vmem:[%s3933_s21 + $0xe8] sm:$0xff] }
 0x14d   : > { %3063 = vmatmul.mubr.msk.f32.gmra.mxu0 %vm537_vm2, %v4345_v27  ;;  %2083 = vmatprep.mubr.f32.mxu1 %v421_v25 }
 0x150   : > { %2084 = vmatmul.mubr.f32.gmra.mxu1 %v420_v31 }
 0x151   : > { %v652_v43 = vpop.f32.mrf.mxu0  ;;  %v861_v29 = vpop.f32.mrf.mxu1  ;;  %2088 = vmatprep.mubr.f32.mxu1 %v423_v58 }
 0x152   : > { %v4541_v8 = vadd.f32 %v861_v29, %v652_v43  ;;  %v434_v29 = vld [vmem:[%s3933_s21 + $0xe0] sm:$0xff] }
 0x153   : > { %v654_v47 = vpop.f32.mrf.mxu0  ;;  %v863_v0 = vpop.f32.mrf.mxu1 }
 0x154   : > { %v4544_v36 = vadd.f32 %v863_v0, %v654_v47  ;;  %2089 = vmatmul.mubr.f32.gmra.mxu1 %v422_v59 }
 0x155   : > { %v658_v55 = vpop.f32.mrf.mxu0  ;;  %v867_v27 = vpop.f32.mrf.mxu1  ;;  %2093 = vmatprep.mubr.f32.mxu1 %v425_v38 }
 0x156   : > { %v4547_v45 = vadd.f32 %v867_v27, %v658_v55  ;;  %v437_v27 = vld [vmem:[%s3933_s21 + $0xf8] sm:$0xff] }
 0x157   : > { %v660_v56 = vpop.f32.mrf.mxu0  ;;  %v869_v46 = vpop.f32.mrf.mxu1 }
 0x158   : > { %v4550_v49 = vadd.f32 %v869_v46, %v660_v56  ;;  %2094 = vmatmul.mubr.f32.gmra.mxu1 %v424_v48  ;;  %v436_v46 = vld [vmem:[%s3933_s21 + $0xf0] sm:$0xff]  ;;  %s3610_s21 = scalar_lea.vmem %s3609_s15, 4096 }
 0x159   : > { %v664_v32 = vpop.f32.mrf.mxu0  ;;  %v873_v12 = vpop.f32.mrf.mxu1  ;;  %2098 = vmatprep.mubr.f32.mxu1 %v427_v34  ;;  %p3612_p1 = scmp.lt.s32.totalorder %s3610_s21, %s3604_s1 }
 0x15a   : > { %v4553_v15 = vadd.f32 %v873_v12, %v664_v32 }
 0x15b   : > { %v666_v20 = vpop.f32.mrf.mxu0  ;;  %v875_v24 = vpop.f32.mrf.mxu1  ;;  %p3613_p4 = por %p3612_p1, %p3611_p13 }
 0x15c   : > { %v4556_v39 = vadd.f32 %v875_v24, %v666_v20  ;;  %2099 = vmatmul.mubr.f32.gmra.mxu1 %v426_v33 }
 0x15d   : > { %v670_v50 = vpop.f32.mrf.mxu0  ;;  %v879_v63 = vpop.f32.mrf.mxu1  ;;  %2103 = vmatprep.mubr.f32.mxu1 %v429_v3  ;;  %p3614_p10 = pnand %p3613_p4, %p3607_p9 }
 0x15e   : > { %v4559_v2 = vadd.f32 %v879_v63, %v670_v50 }
 0x15f   : > { %v672_v19 = vpop.f32.mrf.mxu0  ;;  %v881_v60 = vpop.f32.mrf.mxu1 }
 0x160   : > { %v4562_v57 = vadd.f32 %v881_v60, %v672_v19  ;;  %2104 = vmatmul.mubr.f32.gmra.mxu1 %v428_v41 }
 0x161   : > { %v676_v53 = vpop.f32.mrf.mxu0  ;;  %v885_v1 = vpop.f32.mrf.mxu1  ;;  %2108 = vmatprep.mubr.f32.mxu1 %v431_v42 }
 0x162   : > { %v4565_v4 = vadd.f32 %v885_v1, %v676_v53 }
 0x163   : > { %v678_v40 = vpop.f32.mrf.mxu0  ;;  %v887_v61 = vpop.f32.mrf.mxu1 }
 0x164   : > { %v4568_v9 = vadd.f32 %v887_v61, %v678_v40  ;;  %2109 = vmatmul.mubr.f32.gmra.mxu1 %v430_v37 }
 0x165   : > { %v682_v62 = vpop.f32.mrf.mxu0  ;;  %v891_v11 = vpop.f32.mrf.mxu1  ;;  %2113 = vmatprep.mubr.f32.mxu1 %v433_v18 }
 0x166   : > { %v4571_v54 = vadd.f32 %v891_v11, %v682_v62 }
 0x167   : > { %v684_v6 = vpop.f32.mrf.mxu0  ;;  %v893_v14 = vpop.f32.mrf.mxu1 }
 0x168   : > { %v4574_v17 = vadd.f32 %v893_v14, %v684_v6  ;;  %2114 = vmatmul.mubr.f32.gmra.mxu1 %v432_v21 }
 0x169   : > { %v688_v10 = vpop.f32.mrf.mxu0  ;;  %v897_v51 = vpop.f32.mrf.mxu1  ;;  %2118 = vmatprep.mubr.f32.mxu1 %v435_v52 }
 0x16a   : > { %v4577_v35 = vadd.f32 %v897_v51, %v688_v10 }
 0x16b   : > { %v690_v23 = vpop.f32.mrf.mxu0  ;;  %v899_v30 = vpop.f32.mrf.mxu1 }
 0x16c   : > { %v4580_v5 = vadd.f32 %v899_v30, %v690_v23  ;;  %2119 = vmatmul.mubr.f32.gmra.mxu1 %v434_v29 }
 0x16d   : > { %v694_v7 = vpop.f32.mrf.mxu0  ;;  %v903_v28 = vpop.f32.mrf.mxu1  ;;  %2123 = vmatprep.mubr.f32.mxu1 %v437_v27 }
 0x16e   : > { %v4583_v44 = vadd.f32 %v903_v28, %v694_v7 }
 0x16f   : > { %v696_v26 = vpop.f32.mrf.mxu0  ;;  %v905_v16 = vpop.f32.mrf.mxu1 }
 0x170   : > { %v4586_v43 = vadd.f32 %v905_v16, %v696_v26  ;;  %2124 = vmatmul.mubr.f32.gmra.mxu1 %v436_v46 }
 0x171   : > { %v700_v47 = vpop.f32.mrf.mxu0  ;;  %v909_v0 = vpop.f32.mrf.mxu1 }
 0x172   : > { %v4589_v25 = vadd.f32 %v909_v0, %v700_v47 }
 0x173   : > { %v702_v31 = vpop.f32.mrf.mxu0  ;;  %v911_v55 = vpop.f32.mrf.mxu1 }
 0x174   : > { %v4592_v56 = vadd.f32 %v911_v55, %v702_v31 }
 0x175   : > { %v706_v58 = vpop.f32.mrf.mxu0  ;;  %v915_v59 = vpop.f32.mrf.mxu1 }
 0x176   : > { %v4595_v32 = vadd.f32 %v915_v59, %v706_v58 }
 0x177   : > { %v708_v12 = vpop.f32.mrf.mxu0  ;;  %v917_v20 = vpop.f32.mrf.mxu1 }
 0x178   : > { %v4597_v24 = vadd.f32 %v917_v20, %v708_v12 }
 0x179   : > { %v712_v38 = vpop.f32.mrf.mxu0  ;;  %v921_v48 = vpop.f32.mrf.mxu1 }
 0x17a   : > { %v4599_v50 = vadd.f32 %v921_v48, %v712_v38 }
 0x17b   : > { %v714_v63 = vpop.f32.mrf.mxu0  ;;  %v923_v19 = vpop.f32.mrf.mxu1 }
 0x17c   : > { %v4601_v60 = vadd.f32 %v923_v19, %v714_v63 }
 0x17d   : > { %v718_v34 = vpop.f32.mrf.mxu0  ;;  %v927_v33 = vpop.f32.mrf.mxu1 }
 0x17e   : > { %v4603_v53 = vadd.f32 %v927_v33, %v718_v34 }
 0x17f   : > { %v720_v1 = vpop.f32.mrf.mxu0  ;;  %v929_v40 = vpop.f32.mrf.mxu1 }
 0x180   : > { %v4605_v61 = vadd.f32 %v929_v40, %v720_v1 }
 0x181   : > { %v724_v3 = vpop.f32.mrf.mxu0  ;;  %v933_v41 = vpop.f32.mrf.mxu1 }
 0x182   : > { %v4607_v62 = vadd.f32 %v933_v41, %v724_v3 }
 0x183   : > { %v726_v11 = vpop.f32.mrf.mxu0  ;;  %v935_v6 = vpop.f32.mrf.mxu1 }
 0x184   : > { %v4609_v14 = vadd.f32 %v935_v6, %v726_v11 }
 0x185   : > { %v730_v42 = vpop.f32.mrf.mxu0  ;;  %v939_v37 = vpop.f32.mrf.mxu1 }
 0x186   : > { %v4611_v10 = vadd.f32 %v939_v37, %v730_v42 }
 0x187   : > { %v732_v51 = vpop.f32.mrf.mxu0  ;;  %v941_v23 = vpop.f32.mrf.mxu1 }
 0x188   : > { %v4613_v30 = vadd.f32 %v941_v23, %v732_v51 }
 0x189   : > { %v736_v18 = vpop.f32.mrf.mxu0  ;;  %v945_v21 = vpop.f32.mrf.mxu1 }
 0x18a   : > { %v4615_v7 = vadd.f32 %v945_v21, %v736_v18 }
 0x18b   : > { %v738_v28 = vpop.f32.mrf.mxu0  ;;  %v947_v26 = vpop.f32.mrf.mxu1 }
 0x18c   : > { %v4617_v16 = vadd.f32 %v947_v26, %v738_v28 }
 0x18d   : > { %v742_v52 = vpop.f32.mrf.mxu0  ;;  %v951_v29 = vpop.f32.mrf.mxu1 }
 0x18e   : > { %v4619_v47 = vadd.f32 %v951_v29, %v742_v52 }
 0x18f   : > { %v744_v0 = vpop.f32.mrf.mxu0  ;;  %v953_v31 = vpop.f32.mrf.mxu1 }
 0x190   : > { %v4621_v55 = vadd.f32 %v953_v31, %v744_v0 }
 0x191   : > { %v4623_v27 = vpop.f32.mrf.mxu0  ;;  %v4625_v46 = vpop.f32.mrf.mxu1 }
 0x193   : > { %v1146_v58 = vpop.f32.mrf.mxu0  ;;  %v1461_v59 = vpop.f32.mrf.mxu1 }
 0x194   : > { %v1240_v12 = vadd.f32 %v1146_v58, %v4544_v36 }
 0x195   : > { %v1150_v20 = vpop.f32.mrf.mxu0  ;;  %v1465_v38 = vpop.f32.mrf.mxu1 }
 0x196   : > { %v1241_v48 = vadd.f32 %v1150_v20, %v4547_v45  ;;  %v4629_v63 = vadd.f32 %v1461_v59, %v1240_v12 }
 0x197   : > { %v1152_v19 = vpop.f32.mrf.mxu0  ;;  %v1467_v34 = vpop.f32.mrf.mxu1 }
 0x198   : > { %v1242_v33 = vadd.f32 %v1152_v19, %v4550_v49  ;;  %v4632_v1 = vadd.f32 %v1465_v38, %v1241_v48 }
 0x199   : > { %v1156_v40 = vpop.f32.mrf.mxu0  ;;  %v1471_v3 = vpop.f32.mrf.mxu1 }
 0x19a   : > { %v1243_v41 = vadd.f32 %v1156_v40, %v4553_v15  ;;  %v4635_v11 = vadd.f32 %v1467_v34, %v1242_v33 }
 0x19b   : > { %v1158_v6 = vpop.f32.mrf.mxu0  ;;  %v4637_v36 = vpop.f32.mrf.mxu1 }
 0x19c   : > { %v4640_v42 = vadd.f32 %v1158_v6, %v4556_v39  ;;  %v4642_v45 = vadd.f32 %v1471_v3, %v1243_v41 }
 0x19d   : > { %v1162_v37 = vpop.f32.mrf.mxu0  ;;  %v1477_v51 = vpop.f32.mrf.mxu1 }
 0x19e   : > { %v1245_v49 = vadd.f32 %v1162_v37, %v4559_v2 }
 0x19f   : > { %v1164_v23 = vpop.f32.mrf.mxu0  ;;  %v4645_v18 = vpop.f32.mrf.mxu1 }
 0x1a0   : > { %v4648_v21 = vadd.f32 %v1164_v23, %v4562_v57  ;;  %v4650_v15 = vadd.f32 %v1477_v51, %v1245_v49 }
 0x1a1   : > { %v1168_v28 = vpop.f32.mrf.mxu0  ;;  %v1483_v26 = vpop.f32.mrf.mxu1 }
 0x1a2   : > { %v1247_v52 = vadd.f32 %v1168_v28, %v4565_v4 }
 0x1a3   : > { %v1170_v39 = vpop.f32.mrf.mxu0  ;;  %v4653_v29 = vpop.f32.mrf.mxu1 }
 0x1a4   : > { %v4656_v0 = vadd.f32 %v1170_v39, %v4568_v9  ;;  %v4658_v31 = vadd.f32 %v1483_v26, %v1247_v52 }
 0x1a5   : > { %v1174_v2 = vpop.f32.mrf.mxu0  ;;  %v1489_v58 = vpop.f32.mrf.mxu1 }
 0x1a6   : > { %v1249_v59 = vadd.f32 %v1174_v2, %v4571_v54 }
 0x1a7   : > { %v1176_v57 = vpop.f32.mrf.mxu0  ;;  %v4661_v12 = vpop.f32.mrf.mxu1 }
 0x1a8   : > { %v4664_v20 = vadd.f32 %v1176_v57, %v4574_v17  ;;  %v4666_v38 = vadd.f32 %v1489_v58, %v1249_v59 }
 0x1a9   : > { %v1180_v4 = vpop.f32.mrf.mxu0  ;;  %v1495_v48 = vpop.f32.mrf.mxu1 }
 0x1aa   : > { %v1251_v19 = vadd.f32 %v1180_v4, %v4577_v35 }
 0x1ab   : > { %v1182_v9 = vpop.f32.mrf.mxu0  ;;  %v4669_v34 = vpop.f32.mrf.mxu1 }
 0x1ac   : > { %v4672_v33 = vadd.f32 %v1182_v9, %v4580_v5  ;;  %v4674_v40 = vadd.f32 %v1495_v48, %v1251_v19 }
 0x1ad   : > { %v1186_v54 = vpop.f32.mrf.mxu0  ;;  %v1501_v3 = vpop.f32.mrf.mxu1 }
 0x1ae   : > { %v1253_v41 = vadd.f32 %v1186_v54, %v4583_v44 }
 0x1af   : > { %v4677_v17 = vpop.f32.mrf.mxu0  ;;  %v4679_v6 = vpop.f32.mrf.mxu1 }
 0x1b0   : > { %v4681_v37 = vadd.f32 %v1501_v3, %v1253_v41 }
 0x1b1   : > { %v4683_v51 = vpop.f32.mrf.mxu0  ;;  %v4685_v35 = vpop.f32.mrf.mxu1 }
 0x1b3   : > { %v1194_v49 = vpop.f32.mrf.mxu0  ;;  %v1509_v23 = vpop.f32.mrf.mxu1 }
 0x1b4   : > { %v1256_v5 = vadd.f32 %v1194_v49, %v4592_v56 }
 0x1b5   : > { %v1198_v28 = vpop.f32.mrf.mxu0  ;;  %v1513_v26 = vpop.f32.mrf.mxu1 }
 0x1b6   : > { %v1257_v52 = vadd.f32 %v1198_v28, %v4595_v32  ;;  %v4689_v39 = vadd.f32 %v1509_v23, %v1256_v5 }
 0x1b7   : > { %v1200_v44 = vpop.f32.mrf.mxu0  ;;  %v1515_v2 = vpop.f32.mrf.mxu1 }
 0x1b8   : > { %v1258_v58 = vadd.f32 %v1200_v44, %v4597_v24  ;;  %v4692_v59 = vadd.f32 %v1513_v26, %v1257_v52  ;;  %v3691_v52 = vmov 0  }
 0x1b9   : > { %v1204_v57 = vpop.f32.mrf.mxu0  ;;  %v1519_v4 = vpop.f32.mrf.mxu1  ;;  %3431 = vset.pattern.permute.xlu0 %v3691_v52 }
 0x1ba   : > { %v1259_v48 = vadd.f32 %v1204_v57, %v4599_v50  ;;  %v4695_v19 = vadd.f32 %v1515_v2, %v1258_v58 }
 0x1bb   : > { %v1206_v56 = vpop.f32.mrf.mxu0  ;;  %v4697_v9 = vpop.f32.mrf.mxu1 }
 0x1bc   : > { %v4700_v32 = vadd.f32 %v1206_v56, %v4601_v60  ;;  %v4702_v54 = vadd.f32 %v1519_v4, %v1259_v48  ;;  %v3065_v48 = vld [vmem:[%s385_s18] ss:$0 sm:$0xff] }
 0x1bd   : > { %v1210_v3 = vpop.f32.mrf.mxu0  ;;  %v1525_v41 = vpop.f32.mrf.mxu1  ;;  %2352 = vperm.xlu0 %3431, %v3065_v48  }
 0x1be   : > { %v1261_v24 = vadd.f32 %v1210_v3, %v4603_v53 }
 0x1bf   : > { %v1212_v49 = vpop.f32.mrf.mxu0  ;;  %v4705_v23 = vpop.f32.mrf.mxu1 }
 0x1c0   : > { %v4708_v5 = vadd.f32 %v1212_v49, %v4605_v61  ;;  %v4710_v50 = vadd.f32 %v1525_v41, %v1261_v24  ;;  %v3066_v41 = vld [vmem:[%s385_s18 + $0x1] ss:$0 sm:$0xff] }
 0x1c1   : > { %v1216_v28 = vpop.f32.mrf.mxu0  ;;  %v1531_v26 = vpop.f32.mrf.mxu1  ;;  %2355 = vperm.xlu0 %3431, %v3066_v41  }
 0x1c2   : > { %v1263_v60 = vadd.f32 %v1216_v28, %v4607_v62 }
 0x1c3   : > { %v1218_v44 = vpop.f32.mrf.mxu0  ;;  %v4714_v2 = vpop.f32.mrf.mxu1 }
 0x1c4   : > { %v4717_v53 = vadd.f32 %v1218_v44, %v4609_v14  ;;  %v4719_v58 = vadd.f32 %v1531_v26, %v1263_v60  ;;  %v1239_v60 = vadd.f32 %v4623_v27, %v4541_v8 }
 0x1c5   : > { %v1222_v61 = vpop.f32.mrf.mxu0  ;;  %v1537_v57 = vpop.f32.mrf.mxu1 }
 0x1c6   : > { %v1265_v4 = vadd.f32 %v1222_v61, %v4611_v10  ;;  %v1905_v10 = vsub.s32 0, %v3950_v22  ;;  %v1901_v61 = vld [vmem:[%s5332_s4] sm:$0x3]  ;;  %v1554_v8 = vadd.f32 %v4625_v46, %v1239_v60 }
 0x1c7   : > { %v1224_v56 = vpop.f32.mrf.mxu0  ;;  %v4725_v62 = vpop.f32.mrf.mxu1 }
 0x1c8   : > { %v4728_v3 = vadd.f32 %v1224_v56, %v4613_v30  ;;  %v4730_v14 = vadd.f32 %v1537_v57, %v1265_v4  ;;  %v1909_v4 = vsub.s32 1, %v3950_v22  ;;  %v4750_v41 = vrot.slane %v1901_v61, %v1905_v10 }
 0x1c9   : > { %v1228_v24 = vpop.f32.mrf.mxu0  ;;  %v1543_v49 = vpop.f32.mrf.mxu1 }
 0x1ca   : > { %v1267_v28 = vadd.f32 %v1228_v24, %v4615_v7  ;;  %v4755_v24 = vrot.slane %v1901_v61, %v1909_v4 }
 0x1cb   : > { %v1230_v26 = vpop.f32.mrf.mxu0  ;;  %v4733_v52 = vpop.f32.mrf.mxu1 }
 0x1cc   : > { %v4739_v44 = vadd.f32 %v1230_v26, %v4617_v16  ;;  %v4741_v30 = vadd.f32 %v1543_v49, %v1267_v28 }
 0x1cd   : > { %v1234_v57 = vpop.f32.mrf.mxu0  ;;  %v1549_v7 = vpop.f32.mrf.mxu1 }
 0x1ce   : > { %v1269_v48 = vadd.f32 %v1234_v57, %v4619_v47 }
 0x1cf   : > { %v4748_v56 = vpop.f32.mrf.mxu0 }
 0x1d0   : > { %v4753_v16 = vadd.f32 %v1549_v7, %v1269_v48  ;;  %v1559_v7 = vadd.f32 %v4637_v36, %v4640_v42 }
 0x1d1   : > { %v1774_v27 = vpop.f32.mrf.mxu0 }
 0x1d2   : > { %v1869_v49 = vadd.f32 %v1774_v27, %v1554_v8  ;;  %v1561_v27 = vadd.f32 %v4645_v18, %v4648_v21 }
 0x1d3   : > { %v1776_v28 = vpop.f32.mrf.mxu0 }
 0x1d4   : > { %v1913_v26 = vadd.f32 %v4750_v41, %v1869_v49  ;;  %v1870_v13 = vadd.f32 %v1776_v28, %v4629_v63 }
 0x1d5   : > { %v1780_v22 = vpop.f32.mrf.mxu0 }
 0x1d6   : > { %v4760_v47 = vadd.f32 %v4755_v24, %v1870_v13  ;;  %v1871_v10 = vadd.f32 %v1780_v22, %v4632_v1  ;;  %3255 = vmatprep.mubr.f32.mxu0 %v1913_v26  ;;  %v1563_v26 = vadd.f32 %v4653_v29, %v4656_v0 }
 0x1d7   : > { %v1782_v57 = vpop.f32.mrf.mxu0 }
 0x1d8   : > { %v4764_v46 = vadd.f32 %v4750_v41, %v1871_v10  ;;  %v1872_v60 = vadd.f32 %v1782_v57, %v4635_v11 }
 0x1d9   : > { %v1786_v61 = vpop.f32.mrf.mxu0 }
 0x1da   : > { %v4770_v4 = vadd.f32 %v4755_v24, %v1872_v60  ;;  %v1873_v63 = vadd.f32 %v1786_v61, %v4642_v45  ;;  %v1565_v60 = vadd.f32 %v4661_v12, %v4664_v20 }
 0x1db   : > { %v1788_v13 = vpop.f32.mrf.mxu0 }
 0x1dc   : > { %v4774_v48 = vadd.f32 %v4750_v41, %v1873_v63  ;;  %v1874_v1 = vadd.f32 %v1788_v13, %v1559_v7 }
 0x1dd   : > { %v1792_v8 = vpop.f32.mrf.mxu0 }
 0x1de   : > { %v4779_v11 = vadd.f32 %v4755_v24, %v1874_v1  ;;  %v1875_v49 = vadd.f32 %v1792_v8, %v4650_v15  ;;  %v1254_v1 = vadd.f32 %v4677_v17, %v4586_v43 }
 0x1df   : > { %v1794_v36 = vpop.f32.mrf.mxu0 }
 0x1e0   : > { %v4783_v42 = vadd.f32 %v4750_v41, %v1875_v49  ;;  %v1876_v28 = vadd.f32 %v1794_v36, %v1561_v27 }
 0x1e1   : > { %v1798_v45 = vpop.f32.mrf.mxu0 }
 0x1e2   : > { %v4788_v22 = vadd.f32 %v4755_v24, %v1876_v28  ;;  %v1877_v10 = vadd.f32 %v1798_v45, %v4658_v31  ;;  %v1567_v31 = vadd.f32 %v4669_v34, %v4672_v33  ;;  %v1569_v28 = vadd.f32 %v4679_v6, %v1254_v1 }
 0x1e3   : > { %v1800_v18 = vpop.f32.mrf.mxu0 }
 0x1e4   : > { %v4792_v21 = vadd.f32 %v4750_v41, %v1877_v10  ;;  %v1878_v57 = vadd.f32 %v1800_v18, %v1563_v26 }
 0x1e5   : > { %v1804_v15 = vpop.f32.mrf.mxu0 }
 0x1e6   : > { %v1922_v61 = vadd.f32 %v4755_v24, %v1878_v57  ;;  %v1879_v7 = vadd.f32 %v1804_v15, %v4666_v38  ;;  %v1255_v38 = vadd.f32 %v4683_v51, %v4589_v25  ;;  %v4826_v15 = vpop.f32.mrf.mxu1 }
 0x1e7   : > { %v1806_v63 = vpop.f32.mrf.mxu0 }
 0x1e8   : > { %v4799_v29 = vadd.f32 %v4750_v41, %v1879_v7  ;;  %v1880_v0 = vadd.f32 %v1806_v63, %v1565_v60  ;;  %v1570_v17 = vadd.f32 %v4685_v35, %v1255_v38 }
 0x1e9   : > { %v1810_v13 = vpop.f32.mrf.mxu0 }
 0x1ea   : > { %v1924_v8 = vadd.f32 %v4755_v24, %v1880_v0  ;;  %v1881_v12 = vadd.f32 %v1810_v13, %v4674_v40  ;;  %v1575_v13 = vadd.f32 %v4697_v9, %v4700_v32  ;;  %v1577_v9 = vadd.f32 %v4705_v23, %v4708_v5 }
 0x1eb   : > { %v1812_v20 = vpop.f32.mrf.mxu0  ;;  %v1579_v23 = vadd.f32 %v4714_v2, %v4717_v53  ;;  %v1581_v2 = vadd.f32 %v4725_v62, %v4728_v3  ;;  %v1583_v62 = vadd.f32 %v4733_v52, %v4739_v44  ;;  %v1270_v3 = vadd.f32 %v4748_v56, %v4621_v55 }
 0x1ec   : > { %v4810_v27 = vadd.f32 %v4750_v41, %v1881_v12  ;;  %v1882_v49 = vadd.f32 %v1812_v20, %v1567_v31 }
 0x1ed   : > { %v1816_v36 = vpop.f32.mrf.mxu0  ;;  %v1585_v52 = vadd.f32 %v4826_v15, %v1270_v3 }
 0x1ee   : > { %v1926_v34 = vadd.f32 %v4755_v24, %v1882_v49  ;;  %v1883_v33 = vadd.f32 %v1816_v36, %v4681_v37 }
 0x1ef   : > { %v1818_v43 = vpop.f32.mrf.mxu0 }
 0x1f0   : > { %v4817_v40 = vadd.f32 %v4750_v41, %v1883_v33  ;;  %v1884_v45 = vadd.f32 %v1818_v43, %v1569_v28 }
 0x1f1   : > { %v1822_v26 = vpop.f32.mrf.mxu0 }
 0x1f2   : > { %v1928_v25 = vadd.f32 %v4755_v24, %v1884_v45  ;;  %v1885_v51 = vadd.f32 %v1822_v26, %v1570_v17 }
 0x1f3   : > { %v1824_v10 = vpop.f32.mrf.mxu0 }
 0x1f4   : > { %v1929_v18 = vadd.f32 %v4750_v41, %v1885_v51  ;;  %v1886_v6 = vadd.f32 %v1824_v10, %v4689_v39  ;;  %3239 = vmatprep.subr.mxu0 %v1928_v25  ;;  %v4832_v39 = vpop.f32.mrf.mxu1 }
 0x1f5   : > { %v1828_v57 = vpop.f32.mrf.mxu0  ;;  %3240 = vmatpush3.xpose.msra.mxu0 %v1928_v25 }
 0x1f6   : > { %v4823_v37 = vadd.f32 %v4755_v24, %v1886_v6  ;;  %v1887_v35 = vadd.f32 %v1828_v57, %v4692_v59  ;;  %3241 = vmatprep.subr.mxu0 %v1926_v34  ;;  %3283 = vmatprep.mubr.f32.mxu1 %v1929_v18  ;;  %v4840_v12 = vpop.f32.mrf.mxu1 }
 0x1f7   : > { %v1830_v60 = vpop.f32.mrf.mxu0 }
 0x1f8   : > { %v4829_v7 = vadd.f32 %v4750_v41, %v1887_v35  ;;  %v1888_v63 = vadd.f32 %v1830_v60, %v4695_v19  ;;  %v4845_v49 = vpop.f32.mrf.mxu1 }
 0x1f9   : > { %v1834_v0 = vpop.f32.mrf.mxu0  ;;  %3242 = vmatpush3.xpose.msra.mxu0 %v1926_v34 }
 0x1fa   : > { %v4837_v31 = vadd.f32 %v4755_v24, %v1888_v63  ;;  %v1889_v59 = vadd.f32 %v1834_v0, %v4702_v54  ;;  %3243 = vmatprep.subr.mxu0 %v1924_v8  ;;  %v4853_v28 = vpop.f32.mrf.mxu1 }
 0x1fb   : > { %v1836_v1 = vpop.f32.mrf.mxu0 }
 0x1fc   : > { %v4843_v20 = vadd.f32 %v4750_v41, %v1889_v59  ;;  %v1890_v19 = vadd.f32 %v1836_v1, %v1575_v13 }
 0x1fd   : > { %v1840_v38 = vpop.f32.mrf.mxu0  ;;  %3244 = vmatpush3.xpose.msra.mxu0 %v1924_v8  ;;  %v4858_v8 = vpop.f32.mrf.mxu1 }
 0x1fe   : > { %v4850_v32 = vadd.f32 %v4755_v24, %v1890_v19  ;;  %v1891_v54 = vadd.f32 %v1840_v38, %v4710_v50  ;;  %3245 = vmatprep.subr.mxu0 %v1922_v61 }
 0x1ff   : > { %v1842_v36 = vpop.f32.mrf.mxu0  ;;  %v4867_v45 = vpop.f32.mrf.mxu1 }
 0x200   : > { %v4856_v34 = vadd.f32 %v4750_v41, %v1891_v54  ;;  %v1892_v33 = vadd.f32 %v1842_v36, %v1577_v9 }
 0x201   : > { %v1846_v43 = vpop.f32.mrf.mxu0  ;;  %3246 = vmatpush3.xpose.msra.mxu0 %v1922_v61  ;;  %v3136_v51 = vpop.f32.mrf.mxu1 }
 0x202   : > { %v4863_v5 = vadd.f32 %v4755_v24, %v1892_v33  ;;  %v1893_v50 = vadd.f32 %v1846_v43, %v4719_v58  ;;  %3247 = vmatprep.subr.mxu0 %v4788_v22 }
 0x203   : > { %v1848_v17 = vpop.f32.mrf.mxu0  ;;  %v3137_v18 = vpop.f32.mrf.mxu1 }
 0x204   : > { %v4870_v26 = vadd.f32 %v4750_v41, %v1893_v50  ;;  %v1894_v25 = vadd.f32 %v1848_v17, %v1579_v23  ;;  %v3132_v17 = vadd.f32 %v4853_v28, %v4845_v49 }
 0x205   : > { %v1852_v61 = vpop.f32.mrf.mxu0  ;;  %3248 = vmatpush3.xpose.msra.mxu0 %v4788_v22  ;;  %v3139_v22 = vpop.f32.mrf.mxu1 }
 0x206   : > { %v4876_v53 = vadd.f32 %v4755_v24, %v1894_v25  ;;  %v1895_v58 = vadd.f32 %v1852_v61, %v4730_v14  ;;  %3249 = vmatprep.subr.mxu0 %v4779_v11 }
 0x207   : > { %v1854_v10 = vpop.f32.mrf.mxu0  ;;  %v3140_v0 = vpop.f32.mrf.mxu1 }
 0x208   : > { %v4881_v6 = vadd.f32 %v4750_v41, %v1895_v58  ;;  %v1896_v57 = vadd.f32 %v1854_v10, %v1581_v2  ;;  %v3141_v43 = vadd.f32 %v3140_v0, %v3139_v22 }
 0x209   : > { %v1858_v35 = vpop.f32.mrf.mxu0  ;;  %3250 = vmatpush3.xpose.msra.mxu0 %v4779_v11  ;;  %v3142_v1 = vpop.f32.mrf.mxu1 }
 0x20a   : > { %v1940_v14 = vadd.f32 %v4755_v24, %v1896_v57  ;;  %v1897_v60 = vadd.f32 %v1858_v35, %v4741_v30  ;;  %3251 = vmatprep.subr.mxu0 %v4770_v4 }
 0x20b   : > { %v1860_v63 = vpop.f32.mrf.mxu0  ;;  %v3143_v56 = vpop.f32.mrf.mxu1 }
 0x20c   : > { %v4892_v13 = vadd.f32 %v4750_v41, %v1897_v60  ;;  %v1898_v59 = vadd.f32 %v1860_v63, %v1583_v62 }
 0x20d   : > { %v1864_v11 = vpop.f32.mrf.mxu0  ;;  %3252 = vmatpush3.xpose.msra.mxu0 %v4770_v4  ;;  %v3145_v9 = vpop.f32.mrf.mxu1 }
 0x20e   : > { %v1942_v55 = vadd.f32 %v4755_v24, %v1898_v59  ;;  %v1899_v44 = vadd.f32 %v1864_v11, %v4753_v16  ;;  %3253 = vmatprep.subr.mxu0 %v4760_v47  ;;  %v5370_v59 = vlaneseq }
 0x20f   : > { %v1866_v30 = vpop.f32.mrf.mxu0  ;;  %v3146_v54 = vpop.f32.mrf.mxu1 }
 0x210   : > { %v4900_v19 = vadd.f32 %v4750_v41, %v1899_v44  ;;  %v1900_v38 = vadd.f32 %v1866_v30, %v1585_v52  ;;  %v4909_v41 = vld [vmem:[%s5334_s6] ss:$0 sm:$0xff]  ;;  %v3147_v15 = vadd.f32 %v3146_v54, %v3145_v9  ;;  %v2340_v11 = vand.u32 127, %v5370_v59 }
 0x211   : > { %3254 = vmatpush3.xpose.msra.mxu0 %v4760_v47  ;;  %v3148_v16 = vpop.f32.mrf.mxu1  ;;  %v4958_v49 = vadd.f32 %v3132_v17, %v4909_v41 }
 0x212   : > { %v1944_v4 = vadd.f32 %v4755_v24, %v1900_v38  ;;  %v4919_v33 = vadd.f32 %v3147_v15, %v4909_v41 }
 0x213   : > { %v3149_v36 = vpop.f32.mrf.mxu1 }
 0x214   : > { %3256 = vmatmul.mubr.f32.vlgmr.msra.gmra.mxu0 %v4764_v46  ;;  %3267 = vmatprep.subr.mxu1 %v1944_v4  ;;  %v3150_v47 = vadd.f32 %v3149_v36, %v3148_v16  ;;  %v3144_v46 = vadd.f32 %v3143_v56, %v3142_v1 }
 0x215   : > { %3258 = vmatprep.mubr.f32.mxu0 %v4774_v48  ;;  %3268 = vmatpush3.xpose.msra.mxu1 %v1944_v4  ;;  %v4913_v24 = vpop.f32.mrf.mxu1 }
 0x216   : > { %3269 = vmatprep.subr.mxu1 %v1942_v55  ;;  %v4916_v48 = vadd.f32 %v3150_v47, %v4909_v41  ;;  %v4928_v23 = vadd.f32 %v3144_v46, %v4909_v41 }
 0x218   : > { %3259 = vmatmul.mubr.f32.gmra.mxu0 %v4783_v42  ;;  %3295 = vmatprep.subr.mxu0 %v4916_v48  ;;  %v4924_v42 = vpop.f32.mrf.mxu1 }
 0x219   : > { %3261 = vmatprep.mubr.f32.mxu0 %v4792_v21  ;;  %3270 = vmatpush3.xpose.msra.mxu1 %v1942_v55  ;;  %v3138_v21 = vadd.f32 %v3137_v18, %v3136_v51 }
 0x21a   : > { %3271 = vmatprep.subr.mxu1 %v1940_v14  ;;  %3296 = vmatpush3.msra.mxu0 %v4916_v48  ;;  %v3154_v50 = vpop.f32.mrf.mxu1 }
 0x21b   : > { %3297 = vmatprep.subr.mxu0 %v4919_v33  ;;  %v4944_v25 = vadd.f32 %v3138_v21, %v4909_v41 }
 0x21c   : > { %3262 = vmatmul.mubr.f32.gmra.mxu0 %v4799_v29  ;;  %v3135_v29 = vadd.f32 %v4867_v45, %v4858_v8  ;;  %v3155_v45 = vpop.f32.mrf.mxu1 }
 0x21d   : > { %3264 = vmatprep.mubr.f32.mxu0 %v4810_v27  ;;  %3272 = vmatpush3.xpose.msra.mxu1 %v1940_v14  ;;  %v4936_v27 = vadd.f32 %v3141_v43, %v4909_v41  ;;  %v3156_v22 = vadd.f32 %v3155_v45, %v3154_v50  ;;  %v3153_v14 = vadd.f32 %v4924_v42, %v4913_v24 }
 0x21e   : > { %3273 = vmatprep.subr.mxu1 %v4876_v53  ;;  %3298 = vmatpush3.msra.mxu0 %v4919_v33  ;;  %v4951_v8 = vadd.f32 %v3135_v29, %v4909_v41 }
 0x21f   : > { %3299 = vmatprep.subr.mxu0 %v4928_v23  ;;  %v5012_v0 = vadd.f32 %v3156_v22, %v4909_v41 }
 0x220   : > { %3265 = vmatmul.mubr.f32.gmra.mxu0 %v4817_v40  ;;  %v3129_v40 = vadd.f32 %v4840_v12, %v4832_v39  ;;  %v3157_v12 = vpop.f32.mrf.mxu1 }
 0x221   : > { %3274 = vmatpush3.xpose.msra.mxu1 %v4876_v53  ;;  %3300 = vmatpush3.msra.mxu0 %v4928_v23 }
 0x222   : > { %3275 = vmatprep.subr.mxu1 %v4863_v5  ;;  %3301 = vmatprep.subr.mxu0 %v4936_v27  ;;  %v4963_v39 = vadd.f32 %v3129_v40, %v4909_v41  ;;  %v3158_v28 = vpop.f32.mrf.mxu1 }
 0x223   : > { %3302 = vmatpush3.msra.mxu0 %v4936_v27 }
 0x224   : > { %3303 = vmatprep.subr.mxu0 %v4944_v25 }
 0x225   : > { %3276 = vmatpush3.xpose.msra.mxu1 %v4863_v5  ;;  %3304 = vmatpush3.msra.mxu0 %v4944_v25 }
 0x226   : > { %3277 = vmatprep.subr.mxu1 %v4850_v32  ;;  %3305 = vmatprep.subr.mxu0 %v4951_v8 }
 0x227   : > { %3306 = vmatpush3.msra.mxu0 %v4951_v8 }
 0x228   : > { %3307 = vmatprep.subr.mxu0 %v4958_v49 }
 0x229   : > { %3278 = vmatpush3.xpose.msra.mxu1 %v4850_v32  ;;  %3308 = vmatpush3.msra.mxu0 %v4958_v49  ;;  %v3160_v32 = vpop.f32.mrf.mxu1 }
 0x22a   : > { %3279 = vmatprep.subr.mxu1 %v4837_v31  ;;  %3309 = vmatprep.subr.mxu0 %v4963_v39 }
 0x22b   : > { %3310 = vmatpush3.msra.mxu0 %v4963_v39  ;;  %v3161_v5 = vpop.f32.mrf.mxu1 }
 0x22c   : > { %v3162_v62 = vadd.f32 %v3161_v5, %v3160_v32 }
 0x22d   : > { %3280 = vmatpush3.xpose.msra.mxu1 %v4837_v31  ;;  %v3163_v61 = vpop.f32.mrf.mxu1 }
 0x22e   : > { %3281 = vmatprep.subr.mxu1 %v4823_v37  ;;  %v5007_v63 = vadd.f32 %v3162_v62, %v4909_v41 }
 0x22f   : > { %v3164_v51 = vpop.f32.mrf.mxu1 }
 0x230   : > { %v3165_v57 = vadd.f32 %v3164_v51, %v3163_v61 }
 0x231   : > { %3282 = vmatpush3.xpose.msra.mxu1 %v4823_v37  ;;  %v3166_v31 = vpop.f32.mrf.mxu1 }
 0x232   : > { %v4997_v3 = vadd.f32 %v3165_v57, %v4909_v41 }
 0x233   : > { %v3167_v2 = vpop.f32.mrf.mxu1 }
 0x234   : > { %3284 = vmatmul.mubr.f32.vlgmr.msra.gmra.mxu1 %v4829_v7 }
 0x235   : > { %3286 = vmatprep.mubr.f32.mxu1 %v4843_v20  ;;  %v3169_v53 = vpop.f32.mrf.mxu1 }
 0x237   : > { %v3170_v37 = vpop.f32.mrf.mxu1 }
 0x238   : > { %3287 = vmatmul.mubr.f32.gmra.mxu1 %v4856_v34  ;;  %v3171_v10 = vadd.f32 %v3170_v37, %v3169_v53  ;;  %v3168_v34 = vadd.f32 %v3167_v2, %v3166_v31  ;;  %v2353_v1 = vpop.permute.xlu0 %2352 }
 0x239   : > { %3289 = vmatprep.mubr.f32.mxu1 %v4870_v26  ;;  %v3172_v7 = vpop.f32.mrf.mxu1  ;;  %vm5026_vm9 = vcmp.lt.s32.totalorder %v2340_v11, %v2353_v1 }
 0x23a   : > { %v4987_v26 = vadd.f32 %v3171_v10, %v4909_v41  ;;  %v4992_v35 = vadd.f32 %v3168_v34, %v4909_v41 }
 0x23b   : > { %v3173_v58 = vpop.f32.mrf.mxu1 }
 0x23c   : > { %3290 = vmatmul.mubr.f32.gmra.mxu1 %v4881_v6  ;;  %v3174_v20 = vadd.f32 %v3173_v58, %v3172_v7  ;;  %v3159_v6 = vadd.f32 %v3158_v28, %v3157_v12  ;;  %v2356_v21 = vpop.permute.xlu0 %2355 }
 0x23d   : > { %3292 = vmatprep.mubr.f32.mxu1 %v4892_v13  ;;  %v5017_v13 = vadd.f32 %v3153_v14, %v4909_v41  ;;  %vm5066_vm10 = vcmp.lt.s32.totalorder %v2340_v11, %v2356_v21 }
 0x23e   : > { %v4984_v18 = vadd.f32 %v3174_v20, %v4909_v41  ;;  %v5004_v60 = vadd.f32 %v3159_v6, %v4909_v41 }
 0x240   : > { %3293 = vmatmul.mubr.f32.gmra.mxu1 %v4900_v19  ;;  %3323 = vmatprep.subr.mxu1 %v4984_v18 }
 0x241   : > { %3324 = vmatpush3.msra.mxu1 %v4984_v18 }
 0x242   : > { %3325 = vmatprep.subr.mxu1 %v4987_v26 }
 0x243   : > { %3326 = vmatpush3.msra.mxu1 %v4987_v26 }
 0x244   : > { %3327 = vmatprep.subr.mxu1 %v4992_v35 }
 0x245   : > { %3328 = vmatpush3.msra.mxu1 %v4992_v35 }
 0x246   : > { %3329 = vmatprep.subr.mxu1 %v4997_v3 }
 0x247   : > { %3330 = vmatpush3.msra.mxu1 %v4997_v3 }
 0x248   : > { %3331 = vmatprep.subr.mxu1 %v5007_v63 }
 0x249   : > { %3332 = vmatpush3.msra.mxu1 %v5007_v63 }
 0x24a   : > { %3333 = vmatprep.subr.mxu1 %v5004_v60 }
 0x24b   : > { %3334 = vmatpush3.msra.mxu1 %v5004_v60 }
 0x24c   : > { %3335 = vmatprep.subr.mxu1 %v5012_v0 }
 0x24d   : > { %3336 = vmatpush3.msra.mxu1 %v5012_v0 }
 0x24e   : > { %3337 = vmatprep.subr.mxu1 %v5017_v13 }
 0x24f   : > { %3338 = vmatpush3.msra.mxu1 %v5017_v13 }
 0x2d4   : > { %v3257_v55 = vpop.f32.mrf.mxu0 }
 0x2d5   : > { %v5032_v44 = vsel %vm5026_vm9, %v3257_v55, -1000000.0 }
 0x2d6   : > { %v2195_v30 = vpop.f32.mrf.mxu0  ;;  %v2378_v56 = vsel %vm537_vm2, %v5032_v44, -inf }
 0x2d7   : > { %v5038_v19 = vsel %vm5026_vm9, %v2195_v30, -1000000.0  ;;  %2379 = vmax.xlane.f32.xlu0 %v2378_v56 }
 0x2d8   : > { %v3260_v38 = vpop.f32.mrf.mxu0  ;;  %v2375_v9 = vsel %vm537_vm2, %v5038_v19, -inf }
 0x2d9   : > { %v5044_v4 = vsel %vm5026_vm9, %v3260_v38, -1000000.0  ;;  %2376 = vmax.xlane.f32.xlu1 %v2375_v9 }
 0x2da   : > { %v2205_v54 = vpop.f32.mrf.mxu0  ;;  %v2384_v16 = vsel %vm537_vm2, %v5044_v4, -inf }
 0x2db   : > { %v5050_v41 = vsel %vm5026_vm9, %v2205_v54, -1000000.0 }
 0x2dc   : > { %v3263_v15 = vpop.f32.mrf.mxu0  ;;  %v2381_v36 = vsel %vm537_vm2, %v5050_v41, -inf }
 0x2dd   : > { %2385 = vmax.xlane.f32.xlu1 %v2384_v16  ;;  %v5056_v47 = vsel %vm5026_vm9, %v3263_v15, -1000000.0 }
 0x2de   : > { %v2215_v24 = vpop.f32.mrf.mxu0  ;;  %v2390_v46 = vsel %vm537_vm2, %v5056_v47, -inf }
 0x2df   : > { %v5062_v43 = vsel %vm5026_vm9, %v2215_v24, -1000000.0 }
 0x2e0   : > { %v2387_v42 = vsel %vm537_vm2, %v5062_v43, -inf  ;;  %v3266_v58 = vpop.f32.mrf.mxu0 }
 0x2e1   : > { %2382 = vmax.xlane.f32.xlu1 %v2381_v36  ;;  %v5126_v30 = vsel %vm5026_vm9, %v3266_v58, -1000000.0 }
 0x2e2   : > { %v2225_v22 = vpop.f32.mrf.mxu0  ;;  %v2396_v56 = vsel %vm537_vm2, %v5126_v30, -inf }
 0x2e3   : > { %v5118_v11 = vsel %vm5026_vm9, %v2225_v22, -1000000.0 }
 0x2e4   : > { %v2393_v55 = vsel %vm537_vm2, %v5118_v11, -inf }
 0x2e5   : > { %2391 = vmax.xlane.f32.xlu1 %v2390_v46 }
 0x2e9   : > { %2388 = vmax.xlane.f32.xlu1 %v2387_v42 }
 0x2f4   : > { %v3285_v50 = vpop.f32.mrf.mxu1 }
 0x2f5   : > { %v5072_v17 = vsel %vm5066_vm10, %v3285_v50, -1000000.0 }
 0x2f6   : > { %v2300_v40 = vpop.f32.mrf.mxu1  ;;  %v2402_v45 = vsel %vm537_vm2, %v5072_v17, -inf }
 0x2f7   : > { %v5078_v12 = vsel %vm5066_vm10, %v2300_v40, -1000000.0  ;;  %2403 = vmax.xlane.f32.xlu1 %v2402_v45 }
 0x2f8   : > { %v3288_v28 = vpop.f32.mrf.mxu1  ;;  %v2399_v5 = vsel %vm537_vm2, %v5078_v12, -inf }
 0x2f9   : > { %v5084_v61 = vsel %vm5066_vm10, %v3288_v28, -1000000.0 }
 0x2fa   : > { %v2310_v32 = vpop.f32.mrf.mxu1  ;;  %v2408_v53 = vsel %vm537_vm2, %v5084_v61, -inf }
 0x2fb   : > { %2400 = vmax.xlane.f32.xlu1 %v2399_v5  ;;  %v5096_v7 = vsel %vm5066_vm10, %v2310_v32, -1000000.0 }
 0x2fc   : > { %v3291_v51 = vpop.f32.mrf.mxu1  ;;  %v2405_v34 = vsel %vm537_vm2, %v5096_v7, -inf }
 0x2fd   : > { %v5088_v31 = vsel %vm5066_vm10, %v3291_v51, -1000000.0 }
 0x2fe   : > { %v2320_v2 = vpop.f32.mrf.mxu1  ;;  %v2414_v37 = vsel %vm537_vm2, %v5088_v31, -inf }
 0x2ff   : > { %2409 = vmax.xlane.f32.xlu1 %v2408_v53  ;;  %2415 = vmax.xlane.f32.xlu0 %v2414_v37  ;;  %v5102_v6 = vsel %vm5066_vm10, %v2320_v2, -1000000.0 }
 0x300   : > { %v3294_v20 = vpop.f32.mrf.mxu1  ;;  %v2411_v59 = vsel %vm537_vm2, %v5102_v6, -inf }
 0x301   : > { %v5112_v14 = vsel %vm5066_vm10, %v3294_v20, -1000000.0 }
 0x302   : > { %v2330_v10 = vpop.f32.mrf.mxu1  ;;  %v2420_v1 = vsel %vm537_vm2, %v5112_v14, -inf }
 0x303   : > { %v5106_v57 = vsel %vm5066_vm10, %v2330_v10, -1000000.0  ;;  %2406 = vmax.xlane.f32.xlu1 %v2405_v34 }
 0x304   : > { %v2417_v62 = vsel %vm537_vm2, %v5106_v57, -inf }
 0x305   : > { %2418 = vmax.xlane.f32.xlu0 %v2417_v62 }
 0x307   : > { %2412 = vmax.xlane.f32.xlu1 %v2411_v59 }
 0x309   : > { %2421 = vmax.xlane.f32.xlu0 %v2420_v1 }
 0x30b   : > { %2394 = vmax.xlane.f32.xlu1 %v2393_v55 }
 0x30f   : > { %2397 = vmax.xlane.f32.xlu1 %v2396_v56 }
 0x360   : > { %v2380_v38 = vpop.xlane.xlu0 %2379 }
 0x361   : > { %v2424_v9 = vsub.f32 %v5032_v44, %v2380_v38 }
 0x362   : > { %v2377_v54 = vpop.xlane.xlu1 %2376 }
 0x363   : > { %v2441_v16 = vmul.f32 1.442695, %v2424_v9  ;;  %v2423_v15 = vsub.f32 %v5038_v19, %v2377_v54 }
 0x365   : > { %3432 = vpow2.f32 %v2441_v16  ;;  %v2439_v36 = vmul.f32 1.442695, %v2423_v15 }
 0x366   : > { %v2386_v24 = vpop.xlane.xlu1 %2385 }
 0x367   : > { %3434 = vpow2.f32 %v2439_v36  ;;  %v2426_v52 = vsub.f32 %v5044_v4, %v2386_v24 }
 0x369   : > { %v2445_v46 = vmul.f32 1.442695, %v2426_v52 }
 0x36a   : > { %v2383_v42 = vpop.xlane.xlu1 %2382 }
 0x36b   : > { %3436 = vpow2.f32 %v2445_v46  ;;  %v2425_v21 = vsub.f32 %v5050_v41, %v2383_v42 }
 0x36d   : > { %v2443_v29 = vmul.f32 1.442695, %v2425_v21 }
 0x36e   : > { %v2392_v50 = vpop.xlane.xlu1 %2391 }
 0x36f   : > { %3438 = vpow2.f32 %v2443_v29  ;;  %v2428_v44 = vsub.f32 %v5056_v47, %v2392_v50 }
 0x371   : > { %v2449_v40 = vmul.f32 1.442695, %v2428_v44 }
 0x372   : > { %v5135_v45 = vpop.eup %3432  ;;  %v2389_v19 = vpop.xlane.xlu1 %2388 }
 0x373   : > { %3440 = vpow2.f32 %v2449_v40  ;;  %v2427_v28 = vsub.f32 %v5062_v43, %v2389_v19  ;;  %v2474_v4 = vsel %vm537_vm2, %v5135_v45, 0.0 }
 0x374   : > { %v5140_v32 = vpop.eup %3434  ;;  %2475 = vadd.xlane.f32.xlu1 %v2474_v4 }
 0x375   : > { %v2447_v5 = vmul.f32 1.442695, %v2427_v28  ;;  %v2471_v41 = vsel %vm537_vm2, %v5140_v32, 0.0 }
 0x377   : > { %3442 = vpow2.f32 %v2447_v5 }
 0x378   : > { %v5144_v51 = vpop.eup %3436  ;;  %2472 = vadd.xlane.f32.xlu1 %v2471_v41 }
 0x379   : > { %v2480_v47 = vsel %vm537_vm2, %v5144_v51, 0.0 }
 0x37c   : > { %v5148_v2 = vpop.eup %3438  ;;  %2481 = vadd.xlane.f32.xlu1 %v2480_v47 }
 0x37d   : > { %v2477_v43 = vsel %vm537_vm2, %v5148_v2, 0.0 }
 0x380   : > { %v5152_v53 = vpop.eup %3440  ;;  %v2404_v37 = vpop.xlane.xlu1 %2403  ;;  %2478 = vadd.xlane.f32.xlu1 %v2477_v43 }
 0x381   : > { %v2432_v58 = vsub.f32 %v5072_v17, %v2404_v37  ;;  %v2486_v10 = vsel %vm537_vm2, %v5152_v53, 0.0 }
 0x383   : > { %v2457_v20 = vmul.f32 1.442695, %v2432_v58 }
 0x384   : > { %v5157_v34 = vpop.eup %3442  ;;  %v2401_v22 = vpop.xlane.xlu1 %2400  ;;  %2487 = vadd.xlane.f32.xlu1 %v2486_v10 }
 0x385   : > { %3444 = vpow2.f32 %v2457_v20  ;;  %v2431_v62 = vsub.f32 %v5078_v12, %v2401_v22  ;;  %v2483_v1 = vsel %vm537_vm2, %v5157_v34, 0.0 }
 0x387   : > { %v2455_v59 = vmul.f32 1.442695, %v2431_v62 }
 0x388   : > { %v2410_v55 = vpop.xlane.xlu1 %2409  ;;  %v2416_v56 = vpop.xlane.xlu0 %2415  ;;  %2484 = vadd.xlane.f32.xlu1 %v2483_v1 }
 0x389   : > { %3446 = vpow2.f32 %v2455_v59  ;;  %v2434_v17 = vsub.f32 %v5084_v61, %v2410_v55  ;;  %v2436_v9 = vsub.f32 %v5088_v31, %v2416_v56 }
 0x38b   : > { %v2461_v38 = vmul.f32 1.442695, %v2434_v17  ;;  %v2465_v36 = vmul.f32 1.442695, %v2436_v9 }
 0x38c   : > { %v2407_v54 = vpop.xlane.xlu1 %2406 }
 0x38d   : > { %3448 = vpow2.f32 %v2461_v38  ;;  %v2433_v16 = vsub.f32 %v5096_v7, %v2407_v54 }
 0x38e   : > { %v2419_v15 = vpop.xlane.xlu0 %2418 }
 0x38f   : > { %v2459_v12 = vmul.f32 1.442695, %v2433_v16  ;;  %v2437_v42 = vsub.f32 %v5106_v57, %v2419_v15 }
 0x390   : > { %v2413_v24 = vpop.xlane.xlu1 %2412 }
 0x391   : > { %3450 = vpow2.f32 %v2459_v12  ;;  %v2435_v52 = vsub.f32 %v5102_v6, %v2413_v24  ;;  %v2467_v44 = vmul.f32 1.442695, %v2437_v42 }
 0x392   : > { %v5166_v46 = vpop.eup %3444  ;;  %3452 = vpow2.f32 %v2465_v36  ;;  %v2422_v21 = vpop.xlane.xlu0 %2421 }
 0x393   : > { %v2463_v61 = vmul.f32 1.442695, %v2435_v52  ;;  %v2498_v31 = vsel %vm537_vm2, %v5166_v46, 0.0  ;;  %v2438_v6 = vsub.f32 %v5112_v14, %v2422_v21 }
 0x394   : > { %v2395_v29 = vpop.xlane.xlu1 %2394  ;;  %2499 = vadd.xlane.f32.xlu0 %v2498_v31 }
 0x395   : > { %v2429_v7 = vsub.f32 %v5118_v11, %v2395_v29  ;;  %3454 = vpow2.f32 %v2463_v61  ;;  %v2469_v5 = vmul.f32 1.442695, %v2438_v6 }
 0x396   : > { %v5172_v50 = vpop.eup %3446 }
 0x397   : > { %v2451_v40 = vmul.f32 1.442695, %v2429_v7  ;;  %v2495_v57 = vsel %vm537_vm2, %v5172_v50, 0.0 }
 0x398   : > { %v2398_v19 = vpop.xlane.xlu1 %2397  ;;  %2496 = vadd.xlane.f32.xlu0 %v2495_v57 }
 0x399   : > { %3456 = vpow2.f32 %v2451_v40  ;;  %v2430_v28 = vsub.f32 %v5126_v30, %v2398_v19 }
 0x39a   : > { %v5178_v4 = vpop.eup %3448  ;;  %3458 = vpow2.f32 %v2467_v44 }
 0x39b   : > { %v2453_v11 = vmul.f32 1.442695, %v2430_v28  ;;  %v2504_v41 = vsel %vm537_vm2, %v5178_v4, 0.0 }
 0x39c   : > { %2505 = vadd.xlane.f32.xlu0 %v2504_v41 }
 0x39d   : > { %3460 = vpow2.f32 %v2453_v11 }
 0x39e   : > { %v5182_v14 = vpop.eup %3450  ;;  %3462 = vpow2.f32 %v2469_v5 }
 0x39f   : > { %v2501_v47 = vsel %vm537_vm2, %v5182_v14, 0.0  ;;  %v5186_v43 = vpop.eup %3452 }
 0x3a0   : > { %2502 = vadd.xlane.f32.xlu0 %v2501_v47  ;;  %v2510_v30 = vsel %vm537_vm2, %v5186_v43, 0.0 }
 0x3a2   : > { %v5190_v37 = vpop.eup %3454 }
 0x3a3   : > { %v2507_v10 = vsel %vm537_vm2, %v5190_v37, 0.0 }
 0x3a4   : > { %2511 = vadd.xlane.f32.xlu0 %v2510_v30 }
 0x3a6   : > { %v5192_v58 = vpop.eup %3456 }
 0x3a7   : > { %v2489_v20 = vsel %vm537_vm2, %v5192_v58, 0.0  ;;  %v5198_v22 = vpop.eup %3458 }
 0x3a8   : > { %2490 = vadd.xlane.f32.xlu1 %v2489_v20  ;;  %2508 = vadd.xlane.f32.xlu0 %v2507_v10  ;;  %v2513_v1 = vsel %vm537_vm2, %v5198_v22, 0.0 }
 0x3aa   : > { %v5200_v62 = vpop.eup %3460 }
 0x3ab   : > { %v2492_v59 = vsel %vm537_vm2, %v5200_v62, 0.0  ;;  %v5206_v55 = vpop.eup %3462 }
 0x3ac   : > { %2493 = vadd.xlane.f32.xlu1 %v2492_v59  ;;  %2514 = vadd.xlane.f32.xlu0 %v2513_v1  ;;  %v2516_v56 = vsel %vm537_vm2, %v5206_v55, 0.0 }
 0x3b0   : > { %2517 = vadd.xlane.f32.xlu0 %v2516_v56 }
 0x3fd   : > { %v2476_v17 = vpop.xlane.xlu1 %2475 }
 0x3fe   : > { %3464 = vrcp.f32 %v2476_v17 }
 0x401   : > { %v2473_v38 = vpop.xlane.xlu1 %2472 }
 0x402   : > { %3466 = vrcp.f32 %v2473_v38 }
 0x405   : > { %v2482_v9 = vpop.xlane.xlu1 %2481 }
 0x406   : > { %3468 = vrcp.f32 %v2482_v9 }
 0x409   : > { %v2479_v54 = vpop.xlane.xlu1 %2478 }
 0x40a   : > { %3470 = vrcp.f32 %v2479_v54 }
 0x40b   : > { %v3465_v15 = vpop.eup %3464 }
 0x40c   : > { %v2536_v24 = vmul.f32 %v3465_v15, %v5135_v45 }
 0x40d   : > { %v2488_v16 = vpop.xlane.xlu1 %2487 }
 0x40e   : > { %3472 = vrcp.f32 %v2488_v16 }
 0x40f   : > { %v3467_v36 = vpop.eup %3466 }
 0x410   : > { %v2535_v12 = vmul.f32 %v3467_v36, %v5140_v32 }
 0x411   : > { %v2485_v52 = vpop.xlane.xlu1 %2484 }
 0x412   : > { %3474 = vrcp.f32 %v2485_v52  ;;  %3311 = vmatprep.mubr.msk.f32.mxu0 %vm537_vm2, %v2535_v12 }
 0x413   : > { %3312 = vmatmul.mubr.msk.f32.vlgmr.msra.gmra.mxu0 %vm537_vm2, %v2536_v24  ;;  %v3469_v42 = vpop.eup %3468 }
 0x414   : > { %v2538_v21 = vmul.f32 %v3469_v42, %v5144_v51 }
 0x417   : > { %v3471_v61 = vpop.eup %3470 }
 0x418   : > { %v2537_v31 = vmul.f32 %v3471_v61, %v5148_v2 }
 0x41a   : > { %3314 = vmatprep.mubr.msk.f32.mxu0 %vm537_vm2, %v2537_v31 }
 0x41b   : > { %3315 = vmatmul.mubr.msk.f32.gmra.mxu0 %vm537_vm2, %v2538_v21  ;;  %v3473_v29 = vpop.eup %3472 }
 0x41c   : > { %v2540_v6 = vmul.f32 %v3473_v29, %v5152_v53 }
 0x41d   : > { %v2500_v32 = vpop.xlane.xlu0 %2499 }
 0x41e   : > { %3476 = vrcp.f32 %v2500_v32 }
 0x41f   : > { %v3475_v45 = vpop.eup %3474 }
 0x420   : > { %v2539_v7 = vmul.f32 %v3475_v45, %v5157_v34 }
 0x421   : > { %v2497_v44 = vpop.xlane.xlu0 %2496 }
 0x422   : > { %3478 = vrcp.f32 %v2497_v44  ;;  %3317 = vmatprep.mubr.msk.f32.mxu0 %vm537_vm2, %v2539_v7 }
 0x423   : > { %3318 = vmatmul.mubr.msk.f32.gmra.mxu0 %vm537_vm2, %v2540_v6 }
 0x425   : > { %v2506_v2 = vpop.xlane.xlu0 %2505 }
 0x426   : > { %3480 = vrcp.f32 %v2506_v2 }
 0x429   : > { %v2503_v51 = vpop.xlane.xlu0 %2502 }
 0x42a   : > { %3482 = vrcp.f32 %v2503_v51 }
 0x42b   : > { %v3477_v57 = vpop.eup %3476 }
 0x42c   : > { %v2544_v34 = vmul.f32 %v3477_v57, %v5166_v46 }
 0x42d   : > { %v2512_v40 = vpop.xlane.xlu0 %2511 }
 0x42e   : > { %3484 = vrcp.f32 %v2512_v40 }
 0x42f   : > { %v3479_v19 = vpop.eup %3478 }
 0x430   : > { %v2543_v28 = vmul.f32 %v3479_v19, %v5172_v50 }
 0x431   : > { %v2491_v5 = vpop.xlane.xlu1 %2490  ;;  %v2509_v11 = vpop.xlane.xlu0 %2508 }
 0x432   : > { %3486 = vrcp.f32 %v2491_v5  ;;  %3339 = vmatprep.mubr.msk.f32.mxu1 %vm537_vm2, %v2543_v28 }
 0x433   : > { %3488 = vrcp.f32 %v2509_v11  ;;  %3340 = vmatmul.mubr.msk.f32.vlgmr.msra.gmra.mxu1 %vm537_vm2, %v2544_v34  ;;  %v3481_v47 = vpop.eup %3480 }
 0x434   : > { %v2546_v46 = vmul.f32 %v3481_v47, %v5178_v4 }
 0x435   : > { %v2494_v53 = vpop.xlane.xlu1 %2493  ;;  %v2515_v41 = vpop.xlane.xlu0 %2514 }
 0x436   : > { %3490 = vrcp.f32 %v2494_v53 }
 0x437   : > { %v3483_v30 = vpop.eup %3482  ;;  %3492 = vrcp.f32 %v2515_v41 }
 0x438   : > { %v2545_v20 = vmul.f32 %v3483_v30, %v5182_v14 }
 0x439   : > { %v2518_v50 = vpop.xlane.xlu0 %2517 }
 0x43a   : > { %3494 = vrcp.f32 %v2518_v50  ;;  %3342 = vmatprep.mubr.msk.f32.mxu1 %vm537_vm2, %v2545_v20 }
 0x43b   : > { %3343 = vmatmul.mubr.msk.f32.gmra.mxu1 %vm537_vm2, %v2546_v46  ;;  %v3485_v10 = vpop.eup %3484 }
 0x43c   : > { %v2548_v14 = vmul.f32 %v3485_v10, %v5186_v43 }
 0x43f   : > { %v3487_v59 = vpop.eup %3486 }
 0x440   : > { %v3489_v1 = vpop.eup %3488  ;;  %v2541_v56 = vmul.f32 %v3487_v59, %v5192_v58 }
 0x441   : > { %v2547_v17 = vmul.f32 %v3489_v1, %v5190_v37 }
 0x442   : > { %3320 = vmatprep.mubr.msk.f32.mxu0 %vm537_vm2, %v2541_v56 }
 0x443   : > { %v3491_v38 = vpop.eup %3490  ;;  %3345 = vmatprep.mubr.msk.f32.mxu1 %vm537_vm2, %v2547_v17 }
 0x444   : > { %v3493_v4 = vpop.eup %3492  ;;  %3346 = vmatmul.mubr.msk.f32.gmra.mxu1 %vm537_vm2, %v2548_v14  ;;  %v2542_v9 = vmul.f32 %v3491_v38, %v5200_v62 }
 0x445   : > { %v2549_v54 = vmul.f32 %v3493_v4, %v5198_v22 }
 0x446   : > { %3321 = vmatmul.mubr.msk.f32.gmra.mxu0 %vm537_vm2, %v2542_v9 }
 0x447   : > { %v3495_v58 = vpop.eup %3494  ;;  %3348 = vmatprep.mubr.msk.f32.mxu1 %vm537_vm2, %v2549_v54 }
 0x448   : > { %v2550_v37 = vmul.f32 %v3495_v58, %v5206_v55 }
 0x44a   : > { %3349 = vmatmul.mubr.msk.f32.gmra.mxu1 %vm537_vm2, %v2550_v37 }
 0x4d3   : > { %v3313_v43 = vpop.f32.mrf.mxu0 }
 0x4d4   : > { %v2647_v16 = vadd.f32 %v3313_v43, %v4958_v49 }
 0x4d5   : > { %v2641_v15 = vpop.f32.mrf.mxu0 }
 0x4d6   : > { %2810 = vst [vmem:[%s5245_s11 + $0x8] sm:$0xff] %v2647_v16  ;;  %v2642_v22 = vadd.f32 %v2641_v15, %v4963_v39 }
 0x4d8   : > { %2809 = vst [vmem:[%s5245_s11] sm:$0xff] %v2642_v22 }
 0x4db   : > { %v3316_v62 = vpop.f32.mrf.mxu0 }
 0x4dc   : > { %v2657_v55 = vadd.f32 %v3316_v62, %v4944_v25 }
 0x4dd   : > { %v2651_v49 = vpop.f32.mrf.mxu0 }
 0x4de   : > { %2812 = vst [vmem:[%s5245_s11 + $0x18] sm:$0xff] %v2657_v55  ;;  %v2652_v36 = vadd.f32 %v2651_v49, %v4951_v8 }
 0x4e0   : > { %2811 = vst [vmem:[%s5245_s11 + $0x10] sm:$0xff] %v2652_v36 }
 0x4e3   : > { %v3319_v12 = vpop.f32.mrf.mxu0 }
 0x4e4   : > { %v2667_v24 = vadd.f32 %v3319_v12, %v4928_v23 }
 0x4e5   : > { %v2661_v52 = vpop.f32.mrf.mxu0 }
 0x4e6   : > { %2814 = vst [vmem:[%s5245_s11 + $0x28] sm:$0xff] %v2667_v24  ;;  %v2662_v39 = vadd.f32 %v2661_v52, %v4936_v27 }
 0x4e8   : > { %2813 = vst [vmem:[%s5245_s11 + $0x20] sm:$0xff] %v2662_v39 }
 0x4f3   : > { %v3341_v42 = vpop.f32.mrf.mxu1 }
 0x4f4   : > { %v2776_v25 = vadd.f32 %v3341_v42, %v5012_v0 }
 0x4f5   : > { %v2770_v61 = vpop.f32.mrf.mxu1 }
 0x4f6   : > { %2818 = vst [vmem:[%s5245_s11 + $0x48] sm:$0xff] %v2776_v25  ;;  %v2771_v31 = vadd.f32 %v2770_v61, %v5017_v13 }
 0x4f8   : > { %2817 = vst [vmem:[%s5245_s11 + $0x40] sm:$0xff] %v2771_v31 }
 0x4fb   : > { %v3344_v8 = vpop.f32.mrf.mxu1 }
 0x4fc   : > { %v2786_v23 = vadd.f32 %v3344_v8, %v5007_v63 }
 0x4fd   : > { %v2780_v21 = vpop.f32.mrf.mxu1 }
 0x4fe   : > { %2820 = vst [vmem:[%s5245_s11 + $0x58] sm:$0xff] %v2786_v23  ;;  %v2781_v27 = vadd.f32 %v2780_v21, %v5004_v60 }
 0x500   : > { %2819 = vst [vmem:[%s5245_s11 + $0x50] sm:$0xff] %v2781_v27 }
 0x504   : > { %v3347_v32 = vpop.f32.mrf.mxu1 }
 0x505   : > { %v2796_v0 = vadd.f32 %v3347_v32, %v4992_v35 }
 0x506   : > { %v2790_v29 = vpop.f32.mrf.mxu1  ;;  %v3322_v45 = vpop.f32.mrf.mxu0 }
 0x507   : > { %2822 = vst [vmem:[%s5245_s11 + $0x68] sm:$0xff] %v2796_v0  ;;  %v2791_v13 = vadd.f32 %v2790_v29, %v4997_v3  ;;  %v2677_v63 = vadd.f32 %v3322_v45, %v4916_v48 }
 0x508   : > { %v2671_v7 = vpop.f32.mrf.mxu0 }
 0x509   : > { %2821 = vst [vmem:[%s5245_s11 + $0x60] sm:$0xff] %v2791_v13  ;;  %2816 = vst [vmem:[%s5245_s11 + $0x38] sm:$0xff] %v2677_v63  ;;  %v2672_v60 = vadd.f32 %v2671_v7, %v4919_v33 }
 0x50a   : > { %v3350_v44 = vpop.f32.mrf.mxu1 }
 0x50b   : > { %2815 = vst [vmem:[%s5245_s11 + $0x30] sm:$0xff] %v2672_v60  ;;  %v2806_v35 = vadd.f32 %v3350_v44, %v4984_v18 }
 0x50c   : > { %v2800_v6 = vpop.f32.mrf.mxu1 }
 0x50d   : > { %2824 = vst [vmem:[%s5245_s11 + $0x78] sm:$0xff] %v2806_v35  ;;  %v2801_v48 = vadd.f32 %v2800_v6, %v4987_v26 }
 0x50f   : > { %2823 = vst [vmem:[%s5245_s11 + $0x70] sm:$0xff] %v2801_v48 }
 0x510   : > { %3617 = shalt.err (!%p3614_p10)
}
 0x511   : > { %s3618_s30 = scalar_lea.hbm %s5280_s16, 2048  ;;  %s3622_s18 = scalar_lea.hbm %s5335_s7, 4096 }
 0x512   : > { %p3619_p7 = scmp.ne.s32.totalorder %s5280_s16, %s3618_s30  ;;  %p3623_p6 = scmp.lt.s32.totalorder %s5280_s16, %s5335_s7 }
 0x513   : > { %p3624_p12 = scmp.lt.s32.totalorder %s3622_s18, %s3618_s30 }
 0x514   : > { %p3620_p8 = pnand %p3619_p7, %p5375_p3 }
 0x515   : > { %p3625_p0 = por %p3624_p12, %p3623_p6 }
 0x516   : > { %p3621_p2 = pneg %p3620_p8 }
 0x518   : > { %p3626_p5 = pnand %p3625_p0, %p3621_p2 }
 0x51a   : > { %3629 = shalt.err (!%p3626_p5)
}
 0x51b   : > { %s3693_s20 = smov 128   ;;  %s3694_s23 = smov 8  }
 0x51c   : > { %3363 = dma.vmem_to_hbm [thread:$0]  (%p5375_p3), %s5282_s17, 2048, %s5280_s16, %s2826_s28, %s3693_s20, %s3693_s20, %s3694_s23  }
 0x51d PF: > { %s2855_s11 = sand.u32 1, %s3668_s24   ;;  %p5376_p11 = scmp.ne.s32.totalorder %s5350_s8, 0 }
 0x51e   : > { %p5377_p9 = scmp.ge.s32.totalorder %s3680_s27, 2  ;;  %s2856_s26 = scalar_lea.sflag [#allocation4], %s2855_s11 }
 0x520   : > { %p3380_p13 = pnand %p5377_p9, %p5376_p11 }
 0x522   : > { %p3381_p1 = pneg %p3380_p13 }
 0x524   : > { %3663 = dma.done.wait (%p3381_p1), %s2856_s26, 2048  }
 0x525   : > { %3665 = vsyncadd (%p3381_p1), %s2856_s26, 4294965248  ;;  %s5378_s19 = sld [smem:[#allocation16_spill]]  ;;  %p24_p4 = scmp.ge.s32.totalorder %s3813_s10, 4  }
 0x526   : > { %s5379_s26 = sld [smem:[#allocation17_spill]]  ;;  %s5380_s24 = smov %s3672_s25 }
 0x527   : > { %s5382_s27 = smov %s3813_s10  ;;  %26 = sbr.rel (!%p24_p4) target bundleno = 12 (0xc), region = 121 }
 0x52b   : > { %s5381_s25 = smov %s5378_s19 }
 0x52c   :  { %2861 = vsyncpa [#allocation3], 1 }
 0x52d   :  { %2863 = vsyncpa [#allocation3 + $0x1], 1 }
 0x52e   :  { %2864 = vsyncpa [#allocation6], 1 }
 0x52f   :  { %2866 = vsyncpa [#allocation6 + $0x1], 1 }
 0x530   :  { %2867 = vsyncpa [#allocation9], 1 }
 0x531   :  { %2868 = vsyncpa [#allocation4], 1 }
 0x532   :  { %2870 = vsyncpa [#allocation4 + $0x1], 1 }

</bundles_post_ra>
